<compile_context>
chip_gen: v7x
topology: tpu7x:2x2x1
jax: 0.10.0
libtpu: 0.0.40
codegen_flags: <defaults>
</compile_context>

<pallas_src>
import functools

import jax
import jax.numpy as jnp
from jax.experimental import pallas as pl
from jax.experimental.pallas import tpu as pltpu

MASK_TOKEN_ID = 103                       # e.g. BERT [MASK]
PAD_ID = 0
SPECIAL_LO, SPECIAL_HI = 101, 103         # cls=101, sep=102, mask=103 (contiguous)
RATE = 0.1


def random_mask_kernel(ids_ref, rnd_ref, out_ref, *, rate, mask_id,
                       pad_id, special_lo, special_hi, idx_bits):
    # ids_ref / rnd_ref / out_ref: VMEM (Bt, S) int32
    ids = ids_ref[...]
    rnd = rnd_ref[...]                       # non-negative 31-bit random ints
    Bt, S = ids.shape

    # Eligibility: not pad and not in the contiguous special range (4 VPU ops).
    eligible = (ids != jnp.int32(pad_id)) & (
        (ids < jnp.int32(special_lo)) | (ids > jnp.int32(special_hi)))

    # Per-row n_mask = floor(n_tokens * rate), n_tokens = non-pad count
    # (matches int(len(tokens) * rate) of the reference).
    n_tokens = jnp.sum((ids != jnp.int32(pad_id)).astype(jnp.int32),
                       axis=-1, keepdims=True)                       # (Bt, 1)
    n_mask = jnp.floor(n_tokens.astype(jnp.float32) *
                       jnp.float32(rate)).astype(jnp.int32)          # (Bt, 1)

    # Strictly ordered per-row key: top (31 - idx_bits) random bits, low
    # idx_bits bits = lane index (tie-break).  All keys in a row are distinct.
    lane = jax.lax.broadcasted_iota(jnp.int32, (Bt, S), dimension=1)
    key = ((rnd >> idx_bits) << idx_bits) | lane                     # (Bt, S), >= 0

    # Binary-search the 31-bit key space for T = n_mask-th largest eligible
    # key per row: largest T with count(eligible & key >= T) >= n_mask.
    def body(b, T):
        bit = jnp.int32(1) << (jnp.int32(30) - b)
        cand = T | bit                                               # (Bt, 1)
        cnt = jnp.sum((eligible & (key >= cand)).astype(jnp.int32),
                      axis=-1, keepdims=True)                        # (Bt, 1)
        return jnp.where(cnt >= n_mask, cand, T)

    T = jax.lax.fori_loop(0, 31, body, jnp.zeros((Bt, 1), jnp.int32),
                          unroll=True)

    # Keys are distinct, so this selects exactly n_mask eligible positions
    # (or all eligible if a row has fewer than n_mask of them).
    masked = eligible & (key >= T) & (n_mask > 0)
    out_ref[...] = jnp.where(masked, jnp.int32(mask_id), ids)


def random_mask(ids, rng_key, rate=RATE, mask_id=MASK_TOKEN_ID,
                pad_id=PAD_ID, special_lo=SPECIAL_LO, special_hi=SPECIAL_HI):
    """ids: (B, S) int32; rng_key: jax PRNG key. Returns masked ids (B, S)."""
    B, S = ids.shape
    # Host-side random draw (tiny: B*S*4 bytes); non-negative int32.
    rnd = jax.random.randint(rng_key, (B, S), 0, jnp.iinfo(jnp.int32).max,
                             dtype=jnp.int32)
    idx_bits = max(1, (S - 1).bit_length())   # low bits reserved for tie-break

    # Tile batch over a parallel grid axis (sublane-aligned tiles of 8 rows).
    Bt = 8 if B % 8 == 0 else B
    grid = (B // Bt,)

    kernel = functools.partial(
        random_mask_kernel, rate=float(rate), mask_id=int(mask_id),
        pad_id=int(pad_id), special_lo=int(special_lo),
        special_hi=int(special_hi), idx_bits=idx_bits)

    return pl.pallas_call(
        kernel,
        out_shape=jax.ShapeDtypeStruct((B, S), jnp.int32),
        grid_spec=pltpu.PrefetchScalarGridSpec(
            num_scalar_prefetch=0,
            grid=grid,
            in_specs=[pl.BlockSpec((Bt, S), lambda i: (i, 0)),
                      pl.BlockSpec((Bt, S), lambda i: (i, 0))],
            out_specs=pl.BlockSpec((Bt, S), lambda i: (i, 0)),
        ),
        compiler_params=pltpu.CompilerParams(
            dimension_semantics=("parallel",)),
    )(ids, rnd)


if __name__ == "__main__":
    key = jax.random.PRNGKey(0)
    k_ids, k_mask = jax.random.split(key)

    B, S = 8, 128  # 8 sequences of 128 tokens -> one (8,128) vreg tile

    ids = jax.random.randint(k_ids, (B, S), 1000, 30000, dtype=jnp.int32)
    # Sprinkle special tokens: CLS at start, SEP, trailing PAD.
    ids = ids.at[:, 0].set(101)
    ids = ids.at[:, S - 8].set(102)
    ids = ids.at[:, S - 7:].set(0)

    out = random_mask(ids, k_mask)
    jax.block_until_ready(out)

    # Sanity checks against the reference semantics.
    changed = (out != ids)
    special = (ids == PAD_ID) | ((ids >= SPECIAL_LO) & (ids <= SPECIAL_HI))
    for b in range(B):
        n_tokens = int(jnp.sum(ids[b] != PAD_ID))
        n_mask = int(n_tokens * RATE)
        assert int(changed[b].sum()) == n_mask, "wrong mask count"
    assert bool(jnp.all(jnp.where(changed, out, MASK_TOKEN_ID) == MASK_TOKEN_ID)), \
        "changed tokens must become mask id"
    assert not bool(jnp.any(changed & special)), "special tokens must be untouched"

    print("KERNEL_OK")
</pallas_src>

<mosaic_0001>
module attributes {stable_mosaic.version = 11 : i64} {
  func.func @random_mask_kernel(%arg0: i32, %arg1: memref<8x128xi32, #tpu.memory_space<vmem>>, %arg2: memref<8x128xi32, #tpu.memory_space<vmem>>, %arg3: memref<8x128xi32, #tpu.memory_space<vmem>>) attributes {dimension_semantics = [#tpu.dimension_semantics<parallel>], iteration_bounds = array<i64: 1>, scalar_prefetch = 0 : i64, scratch_operands = 0 : i64, tpu.core_type = #tpu.core_type<tc>, window_params = [{transform_indices = @transform_0, window_bounds = array<i64: 8, 128>}, {transform_indices = @transform_1, window_bounds = array<i64: 8, 128>}, {transform_indices = @transform_2, window_bounds = array<i64: 8, 128>}]} {
    %c0 = arith.constant 0 : index
    %c0_0 = arith.constant 0 : index
    %0 = vector.load %arg1[%c0, %c0_0] : memref<8x128xi32, #tpu.memory_space<vmem>>, vector<8x128xi32>
    %c0_1 = arith.constant 0 : index
    %c0_2 = arith.constant 0 : index
    %1 = vector.load %arg2[%c0_1, %c0_2] : memref<8x128xi32, #tpu.memory_space<vmem>>, vector<8x128xi32>
    %c0_i32 = arith.constant 0 : i32
    %2 = vector.broadcast %c0_i32 : i32 to vector<8x128xi32>
    %3 = arith.cmpi ne, %0, %2 : vector<8x128xi32>
    %c101_i32 = arith.constant 101 : i32
    %4 = vector.broadcast %c101_i32 : i32 to vector<8x128xi32>
    %5 = arith.cmpi slt, %0, %4 : vector<8x128xi32>
    %c103_i32 = arith.constant 103 : i32
    %6 = vector.broadcast %c103_i32 : i32 to vector<8x128xi32>
    %7 = arith.cmpi sgt, %0, %6 : vector<8x128xi32>
    %8 = arith.ori %5, %7 : vector<8x128xi1>
    %9 = arith.andi %3, %8 : vector<8x128xi1>
    %c0_i32_3 = arith.constant 0 : i32
    %10 = vector.broadcast %c0_i32_3 : i32 to vector<8x128xi32>
    %11 = arith.cmpi ne, %0, %10 : vector<8x128xi32>
    %12 = arith.extui %11 : vector<8x128xi1> to vector<8x128xi32>
    %cst = arith.constant dense<0> : vector<8xi32>
    %13 = vector.multi_reduction <add>, %12, %cst [1] : vector<8x128xi32> to vector<8xi32>
    %14 = vector.shape_cast %13 : vector<8xi32> to vector<8x1xi32>
    %15 = arith.sitofp %14 : vector<8x1xi32> to vector<8x1xf32>
    %cst_4 = arith.constant 1.000000e-01 : f32
    %16 = vector.broadcast %cst_4 : f32 to vector<8x1xf32>
    %17 = arith.mulf %15, %16 : vector<8x1xf32>
    %18 = math.floor %17 : vector<8x1xf32>
    %19 = arith.fptosi %18 : vector<8x1xf32> to vector<8x1xi32>
    %20 = tpu.iota {dimensions = array<i32: 1>} : vector<8x128xi32>
    %c7_i32 = arith.constant 7 : i32
    %21 = vector.broadcast %c7_i32 : i32 to vector<8x128xi32>
    %22 = arith.shrsi %1, %21 : vector<8x128xi32>
    %c7_i32_5 = arith.constant 7 : i32
    %23 = vector.broadcast %c7_i32_5 : i32 to vector<8x128xi32>
    %24 = arith.shli %22, %23 : vector<8x128xi32>
    %25 = arith.ori %24, %20 : vector<8x128xi32>
    %c0_i32_6 = arith.constant 0 : i32
    %26 = vector.broadcast %c0_i32_6 : i32 to vector<8x1xi32>
    %c0_i32_7 = arith.constant 0 : i32
    %c30_i32 = arith.constant 30 : i32
    %27 = arith.subi %c30_i32, %c0_i32_7 : i32
    %c1_i32 = arith.constant 1 : i32
    %28 = arith.shli %c1_i32, %27 : i32
    %29 = vector.broadcast %28 : i32 to vector<8x1xi32>
    %30 = arith.ori %26, %29 : vector<8x1xi32>
    %31 = vector.broadcast %30 : vector<8x1xi32> to vector<8x128xi32>
    %32 = arith.cmpi sge, %25, %31 : vector<8x128xi32>
    %33 = arith.andi %9, %32 : vector<8x128xi1>
    %34 = arith.extui %33 : vector<8x128xi1> to vector<8x128xi32>
    %cst_8 = arith.constant dense<0> : vector<8xi32>
    %35 = vector.multi_reduction <add>, %34, %cst_8 [1] : vector<8x128xi32> to vector<8xi32>
    %36 = vector.shape_cast %35 : vector<8xi32> to vector<8x1xi32>
    %37 = arith.cmpi sge, %36, %19 : vector<8x1xi32>
    %38 = arith.select %37, %30, %26 : vector<8x1xi1>, vector<8x1xi32>
    %c1_i32_9 = arith.constant 1 : i32
    %c30_i32_10 = arith.constant 30 : i32
    %39 = arith.subi %c30_i32_10, %c1_i32_9 : i32
    %c1_i32_11 = arith.constant 1 : i32
    %40 = arith.shli %c1_i32_11, %39 : i32
    %41 = vector.broadcast %40 : i32 to vector<8x1xi32>
    %42 = arith.ori %38, %41 : vector<8x1xi32>
    %43 = vector.broadcast %42 : vector<8x1xi32> to vector<8x128xi32>
    %44 = arith.cmpi sge, %25, %43 : vector<8x128xi32>
    %45 = arith.andi %9, %44 : vector<8x128xi1>
    %46 = arith.extui %45 : vector<8x128xi1> to vector<8x128xi32>
    %cst_12 = arith.constant dense<0> : vector<8xi32>
    %47 = vector.multi_reduction <add>, %46, %cst_12 [1] : vector<8x128xi32> to vector<8xi32>
    %48 = vector.shape_cast %47 : vector<8xi32> to vector<8x1xi32>
    %49 = arith.cmpi sge, %48, %19 : vector<8x1xi32>
    %50 = arith.select %49, %42, %38 : vector<8x1xi1>, vector<8x1xi32>
    %c2_i32 = arith.constant 2 : i32
    %c30_i32_13 = arith.constant 30 : i32
    %51 = arith.subi %c30_i32_13, %c2_i32 : i32
    %c1_i32_14 = arith.constant 1 : i32
    %52 = arith.shli %c1_i32_14, %51 : i32
    %53 = vector.broadcast %52 : i32 to vector<8x1xi32>
    %54 = arith.ori %50, %53 : vector<8x1xi32>
    %55 = vector.broadcast %54 : vector<8x1xi32> to vector<8x128xi32>
    %56 = arith.cmpi sge, %25, %55 : vector<8x128xi32>
    %57 = arith.andi %9, %56 : vector<8x128xi1>
    %58 = arith.extui %57 : vector<8x128xi1> to vector<8x128xi32>
    %cst_15 = arith.constant dense<0> : vector<8xi32>
    %59 = vector.multi_reduction <add>, %58, %cst_15 [1] : vector<8x128xi32> to vector<8xi32>
    %60 = vector.shape_cast %59 : vector<8xi32> to vector<8x1xi32>
    %61 = arith.cmpi sge, %60, %19 : vector<8x1xi32>
    %62 = arith.select %61, %54, %50 : vector<8x1xi1>, vector<8x1xi32>
    %c3_i32 = arith.constant 3 : i32
    %c30_i32_16 = arith.constant 30 : i32
    %63 = arith.subi %c30_i32_16, %c3_i32 : i32
    %c1_i32_17 = arith.constant 1 : i32
    %64 = arith.shli %c1_i32_17, %63 : i32
    %65 = vector.broadcast %64 : i32 to vector<8x1xi32>
    %66 = arith.ori %62, %65 : vector<8x1xi32>
    %67 = vector.broadcast %66 : vector<8x1xi32> to vector<8x128xi32>
    %68 = arith.cmpi sge, %25, %67 : vector<8x128xi32>
    %69 = arith.andi %9, %68 : vector<8x128xi1>
    %70 = arith.extui %69 : vector<8x128xi1> to vector<8x128xi32>
    %cst_18 = arith.constant dense<0> : vector<8xi32>
    %71 = vector.multi_reduction <add>, %70, %cst_18 [1] : vector<8x128xi32> to vector<8xi32>
    %72 = vector.shape_cast %71 : vector<8xi32> to vector<8x1xi32>
    %73 = arith.cmpi sge, %72, %19 : vector<8x1xi32>
    %74 = arith.select %73, %66, %62 : vector<8x1xi1>, vector<8x1xi32>
    %c4_i32 = arith.constant 4 : i32
    %c30_i32_19 = arith.constant 30 : i32
    %75 = arith.subi %c30_i32_19, %c4_i32 : i32
    %c1_i32_20 = arith.constant 1 : i32
    %76 = arith.shli %c1_i32_20, %75 : i32
    %77 = vector.broadcast %76 : i32 to vector<8x1xi32>
    %78 = arith.ori %74, %77 : vector<8x1xi32>
    %79 = vector.broadcast %78 : vector<8x1xi32> to vector<8x128xi32>
    %80 = arith.cmpi sge, %25, %79 : vector<8x128xi32>
    %81 = arith.andi %9, %80 : vector<8x128xi1>
    %82 = arith.extui %81 : vector<8x128xi1> to vector<8x128xi32>
    %cst_21 = arith.constant dense<0> : vector<8xi32>
    %83 = vector.multi_reduction <add>, %82, %cst_21 [1] : vector<8x128xi32> to vector<8xi32>
    %84 = vector.shape_cast %83 : vector<8xi32> to vector<8x1xi32>
    %85 = arith.cmpi sge, %84, %19 : vector<8x1xi32>
    %86 = arith.select %85, %78, %74 : vector<8x1xi1>, vector<8x1xi32>
    %c5_i32 = arith.constant 5 : i32
    %c30_i32_22 = arith.constant 30 : i32
    %87 = arith.subi %c30_i32_22, %c5_i32 : i32
    %c1_i32_23 = arith.constant 1 : i32
    %88 = arith.shli %c1_i32_23, %87 : i32
    %89 = vector.broadcast %88 : i32 to vector<8x1xi32>
    %90 = arith.ori %86, %89 : vector<8x1xi32>
    %91 = vector.broadcast %90 : vector<8x1xi32> to vector<8x128xi32>
    %92 = arith.cmpi sge, %25, %91 : vector<8x128xi32>
    %93 = arith.andi %9, %92 : vector<8x128xi1>
    %94 = arith.extui %93 : vector<8x128xi1> to vector<8x128xi32>
    %cst_24 = arith.constant dense<0> : vector<8xi32>
    %95 = vector.multi_reduction <add>, %94, %cst_24 [1] : vector<8x128xi32> to vector<8xi32>
    %96 = vector.shape_cast %95 : vector<8xi32> to vector<8x1xi32>
    %97 = arith.cmpi sge, %96, %19 : vector<8x1xi32>
    %98 = arith.select %97, %90, %86 : vector<8x1xi1>, vector<8x1xi32>
    %c6_i32 = arith.constant 6 : i32
    %c30_i32_25 = arith.constant 30 : i32
    %99 = arith.subi %c30_i32_25, %c6_i32 : i32
    %c1_i32_26 = arith.constant 1 : i32
    %100 = arith.shli %c1_i32_26, %99 : i32
    %101 = vector.broadcast %100 : i32 to vector<8x1xi32>
    %102 = arith.ori %98, %101 : vector<8x1xi32>
    %103 = vector.broadcast %102 : vector<8x1xi32> to vector<8x128xi32>
    %104 = arith.cmpi sge, %25, %103 : vector<8x128xi32>
    %105 = arith.andi %9, %104 : vector<8x128xi1>
    %106 = arith.extui %105 : vector<8x128xi1> to vector<8x128xi32>
    %cst_27 = arith.constant dense<0> : vector<8xi32>
    %107 = vector.multi_reduction <add>, %106, %cst_27 [1] : vector<8x128xi32> to vector<8xi32>
    %108 = vector.shape_cast %107 : vector<8xi32> to vector<8x1xi32>
    %109 = arith.cmpi sge, %108, %19 : vector<8x1xi32>
    %110 = arith.select %109, %102, %98 : vector<8x1xi1>, vector<8x1xi32>
    %c7_i32_28 = arith.constant 7 : i32
    %c30_i32_29 = arith.constant 30 : i32
    %111 = arith.subi %c30_i32_29, %c7_i32_28 : i32
    %c1_i32_30 = arith.constant 1 : i32
    %112 = arith.shli %c1_i32_30, %111 : i32
    %113 = vector.broadcast %112 : i32 to vector<8x1xi32>
    %114 = arith.ori %110, %113 : vector<8x1xi32>
    %115 = vector.broadcast %114 : vector<8x1xi32> to vector<8x128xi32>
    %116 = arith.cmpi sge, %25, %115 : vector<8x128xi32>
    %117 = arith.andi %9, %116 : vector<8x128xi1>
    %118 = arith.extui %117 : vector<8x128xi1> to vector<8x128xi32>
    %cst_31 = arith.constant dense<0> : vector<8xi32>
    %119 = vector.multi_reduction <add>, %118, %cst_31 [1] : vector<8x128xi32> to vector<8xi32>
    %120 = vector.shape_cast %119 : vector<8xi32> to vector<8x1xi32>
    %121 = arith.cmpi sge, %120, %19 : vector<8x1xi32>
    %122 = arith.select %121, %114, %110 : vector<8x1xi1>, vector<8x1xi32>
    %c8_i32 = arith.constant 8 : i32
    %c30_i32_32 = arith.constant 30 : i32
    %123 = arith.subi %c30_i32_32, %c8_i32 : i32
    %c1_i32_33 = arith.constant 1 : i32
    %124 = arith.shli %c1_i32_33, %123 : i32
    %125 = vector.broadcast %124 : i32 to vector<8x1xi32>
    %126 = arith.ori %122, %125 : vector<8x1xi32>
    %127 = vector.broadcast %126 : vector<8x1xi32> to vector<8x128xi32>
    %128 = arith.cmpi sge, %25, %127 : vector<8x128xi32>
    %129 = arith.andi %9, %128 : vector<8x128xi1>
    %130 = arith.extui %129 : vector<8x128xi1> to vector<8x128xi32>
    %cst_34 = arith.constant dense<0> : vector<8xi32>
    %131 = vector.multi_reduction <add>, %130, %cst_34 [1] : vector<8x128xi32> to vector<8xi32>
    %132 = vector.shape_cast %131 : vector<8xi32> to vector<8x1xi32>
    %133 = arith.cmpi sge, %132, %19 : vector<8x1xi32>
    %134 = arith.select %133, %126, %122 : vector<8x1xi1>, vector<8x1xi32>
    %c9_i32 = arith.constant 9 : i32
    %c30_i32_35 = arith.constant 30 : i32
    %135 = arith.subi %c30_i32_35, %c9_i32 : i32
    %c1_i32_36 = arith.constant 1 : i32
    %136 = arith.shli %c1_i32_36, %135 : i32
    %137 = vector.broadcast %136 : i32 to vector<8x1xi32>
    %138 = arith.ori %134, %137 : vector<8x1xi32>
    %139 = vector.broadcast %138 : vector<8x1xi32> to vector<8x128xi32>
    %140 = arith.cmpi sge, %25, %139 : vector<8x128xi32>
    %141 = arith.andi %9, %140 : vector<8x128xi1>
    %142 = arith.extui %141 : vector<8x128xi1> to vector<8x128xi32>
    %cst_37 = arith.constant dense<0> : vector<8xi32>
    %143 = vector.multi_reduction <add>, %142, %cst_37 [1] : vector<8x128xi32> to vector<8xi32>
    %144 = vector.shape_cast %143 : vector<8xi32> to vector<8x1xi32>
    %145 = arith.cmpi sge, %144, %19 : vector<8x1xi32>
    %146 = arith.select %145, %138, %134 : vector<8x1xi1>, vector<8x1xi32>
    %c10_i32 = arith.constant 10 : i32
    %c30_i32_38 = arith.constant 30 : i32
    %147 = arith.subi %c30_i32_38, %c10_i32 : i32
    %c1_i32_39 = arith.constant 1 : i32
    %148 = arith.shli %c1_i32_39, %147 : i32
    %149 = vector.broadcast %148 : i32 to vector<8x1xi32>
    %150 = arith.ori %146, %149 : vector<8x1xi32>
    %151 = vector.broadcast %150 : vector<8x1xi32> to vector<8x128xi32>
    %152 = arith.cmpi sge, %25, %151 : vector<8x128xi32>
    %153 = arith.andi %9, %152 : vector<8x128xi1>
    %154 = arith.extui %153 : vector<8x128xi1> to vector<8x128xi32>
    %cst_40 = arith.constant dense<0> : vector<8xi32>
    %155 = vector.multi_reduction <add>, %154, %cst_40 [1] : vector<8x128xi32> to vector<8xi32>
    %156 = vector.shape_cast %155 : vector<8xi32> to vector<8x1xi32>
    %157 = arith.cmpi sge, %156, %19 : vector<8x1xi32>
    %158 = arith.select %157, %150, %146 : vector<8x1xi1>, vector<8x1xi32>
    %c11_i32 = arith.constant 11 : i32
    %c30_i32_41 = arith.constant 30 : i32
    %159 = arith.subi %c30_i32_41, %c11_i32 : i32
    %c1_i32_42 = arith.constant 1 : i32
    %160 = arith.shli %c1_i32_42, %159 : i32
    %161 = vector.broadcast %160 : i32 to vector<8x1xi32>
    %162 = arith.ori %158, %161 : vector<8x1xi32>
    %163 = vector.broadcast %162 : vector<8x1xi32> to vector<8x128xi32>
    %164 = arith.cmpi sge, %25, %163 : vector<8x128xi32>
    %165 = arith.andi %9, %164 : vector<8x128xi1>
    %166 = arith.extui %165 : vector<8x128xi1> to vector<8x128xi32>
    %cst_43 = arith.constant dense<0> : vector<8xi32>
    %167 = vector.multi_reduction <add>, %166, %cst_43 [1] : vector<8x128xi32> to vector<8xi32>
    %168 = vector.shape_cast %167 : vector<8xi32> to vector<8x1xi32>
    %169 = arith.cmpi sge, %168, %19 : vector<8x1xi32>
    %170 = arith.select %169, %162, %158 : vector<8x1xi1>, vector<8x1xi32>
    %c12_i32 = arith.constant 12 : i32
    %c30_i32_44 = arith.constant 30 : i32
    %171 = arith.subi %c30_i32_44, %c12_i32 : i32
    %c1_i32_45 = arith.constant 1 : i32
    %172 = arith.shli %c1_i32_45, %171 : i32
    %173 = vector.broadcast %172 : i32 to vector<8x1xi32>
    %174 = arith.ori %170, %173 : vector<8x1xi32>
    %175 = vector.broadcast %174 : vector<8x1xi32> to vector<8x128xi32>
    %176 = arith.cmpi sge, %25, %175 : vector<8x128xi32>
    %177 = arith.andi %9, %176 : vector<8x128xi1>
    %178 = arith.extui %177 : vector<8x128xi1> to vector<8x128xi32>
    %cst_46 = arith.constant dense<0> : vector<8xi32>
    %179 = vector.multi_reduction <add>, %178, %cst_46 [1] : vector<8x128xi32> to vector<8xi32>
    %180 = vector.shape_cast %179 : vector<8xi32> to vector<8x1xi32>
    %181 = arith.cmpi sge, %180, %19 : vector<8x1xi32>
    %182 = arith.select %181, %174, %170 : vector<8x1xi1>, vector<8x1xi32>
    %c13_i32 = arith.constant 13 : i32
    %c30_i32_47 = arith.constant 30 : i32
    %183 = arith.subi %c30_i32_47, %c13_i32 : i32
    %c1_i32_48 = arith.constant 1 : i32
    %184 = arith.shli %c1_i32_48, %183 : i32
    %185 = vector.broadcast %184 : i32 to vector<8x1xi32>
    %186 = arith.ori %182, %185 : vector<8x1xi32>
    %187 = vector.broadcast %186 : vector<8x1xi32> to vector<8x128xi32>
    %188 = arith.cmpi sge, %25, %187 : vector<8x128xi32>
    %189 = arith.andi %9, %188 : vector<8x128xi1>
    %190 = arith.extui %189 : vector<8x128xi1> to vector<8x128xi32>
    %cst_49 = arith.constant dense<0> : vector<8xi32>
    %191 = vector.multi_reduction <add>, %190, %cst_49 [1] : vector<8x128xi32> to vector<8xi32>
    %192 = vector.shape_cast %191 : vector<8xi32> to vector<8x1xi32>
    %193 = arith.cmpi sge, %192, %19 : vector<8x1xi32>
    %194 = arith.select %193, %186, %182 : vector<8x1xi1>, vector<8x1xi32>
    %c14_i32 = arith.constant 14 : i32
    %c30_i32_50 = arith.constant 30 : i32
    %195 = arith.subi %c30_i32_50, %c14_i32 : i32
    %c1_i32_51 = arith.constant 1 : i32
    %196 = arith.shli %c1_i32_51, %195 : i32
    %197 = vector.broadcast %196 : i32 to vector<8x1xi32>
    %198 = arith.ori %194, %197 : vector<8x1xi32>
    %199 = vector.broadcast %198 : vector<8x1xi32> to vector<8x128xi32>
    %200 = arith.cmpi sge, %25, %199 : vector<8x128xi32>
    %201 = arith.andi %9, %200 : vector<8x128xi1>
    %202 = arith.extui %201 : vector<8x128xi1> to vector<8x128xi32>
    %cst_52 = arith.constant dense<0> : vector<8xi32>
    %203 = vector.multi_reduction <add>, %202, %cst_52 [1] : vector<8x128xi32> to vector<8xi32>
    %204 = vector.shape_cast %203 : vector<8xi32> to vector<8x1xi32>
    %205 = arith.cmpi sge, %204, %19 : vector<8x1xi32>
    %206 = arith.select %205, %198, %194 : vector<8x1xi1>, vector<8x1xi32>
    %c15_i32 = arith.constant 15 : i32
    %c30_i32_53 = arith.constant 30 : i32
    %207 = arith.subi %c30_i32_53, %c15_i32 : i32
    %c1_i32_54 = arith.constant 1 : i32
    %208 = arith.shli %c1_i32_54, %207 : i32
    %209 = vector.broadcast %208 : i32 to vector<8x1xi32>
    %210 = arith.ori %206, %209 : vector<8x1xi32>
    %211 = vector.broadcast %210 : vector<8x1xi32> to vector<8x128xi32>
    %212 = arith.cmpi sge, %25, %211 : vector<8x128xi32>
    %213 = arith.andi %9, %212 : vector<8x128xi1>
    %214 = arith.extui %213 : vector<8x128xi1> to vector<8x128xi32>
    %cst_55 = arith.constant dense<0> : vector<8xi32>
    %215 = vector.multi_reduction <add>, %214, %cst_55 [1] : vector<8x128xi32> to vector<8xi32>
    %216 = vector.shape_cast %215 : vector<8xi32> to vector<8x1xi32>
    %217 = arith.cmpi sge, %216, %19 : vector<8x1xi32>
    %218 = arith.select %217, %210, %206 : vector<8x1xi1>, vector<8x1xi32>
    %c16_i32 = arith.constant 16 : i32
    %c30_i32_56 = arith.constant 30 : i32
    %219 = arith.subi %c30_i32_56, %c16_i32 : i32
    %c1_i32_57 = arith.constant 1 : i32
    %220 = arith.shli %c1_i32_57, %219 : i32
    %221 = vector.broadcast %220 : i32 to vector<8x1xi32>
    %222 = arith.ori %218, %221 : vector<8x1xi32>
    %223 = vector.broadcast %222 : vector<8x1xi32> to vector<8x128xi32>
    %224 = arith.cmpi sge, %25, %223 : vector<8x128xi32>
    %225 = arith.andi %9, %224 : vector<8x128xi1>
    %226 = arith.extui %225 : vector<8x128xi1> to vector<8x128xi32>
    %cst_58 = arith.constant dense<0> : vector<8xi32>
    %227 = vector.multi_reduction <add>, %226, %cst_58 [1] : vector<8x128xi32> to vector<8xi32>
    %228 = vector.shape_cast %227 : vector<8xi32> to vector<8x1xi32>
    %229 = arith.cmpi sge, %228, %19 : vector<8x1xi32>
    %230 = arith.select %229, %222, %218 : vector<8x1xi1>, vector<8x1xi32>
    %c17_i32 = arith.constant 17 : i32
    %c30_i32_59 = arith.constant 30 : i32
    %231 = arith.subi %c30_i32_59, %c17_i32 : i32
    %c1_i32_60 = arith.constant 1 : i32
    %232 = arith.shli %c1_i32_60, %231 : i32
    %233 = vector.broadcast %232 : i32 to vector<8x1xi32>
    %234 = arith.ori %230, %233 : vector<8x1xi32>
    %235 = vector.broadcast %234 : vector<8x1xi32> to vector<8x128xi32>
    %236 = arith.cmpi sge, %25, %235 : vector<8x128xi32>
    %237 = arith.andi %9, %236 : vector<8x128xi1>
    %238 = arith.extui %237 : vector<8x128xi1> to vector<8x128xi32>
    %cst_61 = arith.constant dense<0> : vector<8xi32>
    %239 = vector.multi_reduction <add>, %238, %cst_61 [1] : vector<8x128xi32> to vector<8xi32>
    %240 = vector.shape_cast %239 : vector<8xi32> to vector<8x1xi32>
    %241 = arith.cmpi sge, %240, %19 : vector<8x1xi32>
    %242 = arith.select %241, %234, %230 : vector<8x1xi1>, vector<8x1xi32>
    %c18_i32 = arith.constant 18 : i32
    %c30_i32_62 = arith.constant 30 : i32
    %243 = arith.subi %c30_i32_62, %c18_i32 : i32
    %c1_i32_63 = arith.constant 1 : i32
    %244 = arith.shli %c1_i32_63, %243 : i32
    %245 = vector.broadcast %244 : i32 to vector<8x1xi32>
    %246 = arith.ori %242, %245 : vector<8x1xi32>
    %247 = vector.broadcast %246 : vector<8x1xi32> to vector<8x128xi32>
    %248 = arith.cmpi sge, %25, %247 : vector<8x128xi32>
    %249 = arith.andi %9, %248 : vector<8x128xi1>
    %250 = arith.extui %249 : vector<8x128xi1> to vector<8x128xi32>
    %cst_64 = arith.constant dense<0> : vector<8xi32>
    %251 = vector.multi_reduction <add>, %250, %cst_64 [1] : vector<8x128xi32> to vector<8xi32>
    %252 = vector.shape_cast %251 : vector<8xi32> to vector<8x1xi32>
    %253 = arith.cmpi sge, %252, %19 : vector<8x1xi32>
    %254 = arith.select %253, %246, %242 : vector<8x1xi1>, vector<8x1xi32>
    %c19_i32 = arith.constant 19 : i32
    %c30_i32_65 = arith.constant 30 : i32
    %255 = arith.subi %c30_i32_65, %c19_i32 : i32
    %c1_i32_66 = arith.constant 1 : i32
    %256 = arith.shli %c1_i32_66, %255 : i32
    %257 = vector.broadcast %256 : i32 to vector<8x1xi32>
    %258 = arith.ori %254, %257 : vector<8x1xi32>
    %259 = vector.broadcast %258 : vector<8x1xi32> to vector<8x128xi32>
    %260 = arith.cmpi sge, %25, %259 : vector<8x128xi32>
    %261 = arith.andi %9, %260 : vector<8x128xi1>
    %262 = arith.extui %261 : vector<8x128xi1> to vector<8x128xi32>
    %cst_67 = arith.constant dense<0> : vector<8xi32>
    %263 = vector.multi_reduction <add>, %262, %cst_67 [1] : vector<8x128xi32> to vector<8xi32>
    %264 = vector.shape_cast %263 : vector<8xi32> to vector<8x1xi32>
    %265 = arith.cmpi sge, %264, %19 : vector<8x1xi32>
    %266 = arith.select %265, %258, %254 : vector<8x1xi1>, vector<8x1xi32>
    %c20_i32 = arith.constant 20 : i32
    %c30_i32_68 = arith.constant 30 : i32
    %267 = arith.subi %c30_i32_68, %c20_i32 : i32
    %c1_i32_69 = arith.constant 1 : i32
    %268 = arith.shli %c1_i32_69, %267 : i32
    %269 = vector.broadcast %268 : i32 to vector<8x1xi32>
    %270 = arith.ori %266, %269 : vector<8x1xi32>
    %271 = vector.broadcast %270 : vector<8x1xi32> to vector<8x128xi32>
    %272 = arith.cmpi sge, %25, %271 : vector<8x128xi32>
    %273 = arith.andi %9, %272 : vector<8x128xi1>
    %274 = arith.extui %273 : vector<8x128xi1> to vector<8x128xi32>
    %cst_70 = arith.constant dense<0> : vector<8xi32>
    %275 = vector.multi_reduction <add>, %274, %cst_70 [1] : vector<8x128xi32> to vector<8xi32>
    %276 = vector.shape_cast %275 : vector<8xi32> to vector<8x1xi32>
    %277 = arith.cmpi sge, %276, %19 : vector<8x1xi32>
    %278 = arith.select %277, %270, %266 : vector<8x1xi1>, vector<8x1xi32>
    %c21_i32 = arith.constant 21 : i32
    %c30_i32_71 = arith.constant 30 : i32
    %279 = arith.subi %c30_i32_71, %c21_i32 : i32
    %c1_i32_72 = arith.constant 1 : i32
    %280 = arith.shli %c1_i32_72, %279 : i32
    %281 = vector.broadcast %280 : i32 to vector<8x1xi32>
    %282 = arith.ori %278, %281 : vector<8x1xi32>
    %283 = vector.broadcast %282 : vector<8x1xi32> to vector<8x128xi32>
    %284 = arith.cmpi sge, %25, %283 : vector<8x128xi32>
    %285 = arith.andi %9, %284 : vector<8x128xi1>
    %286 = arith.extui %285 : vector<8x128xi1> to vector<8x128xi32>
    %cst_73 = arith.constant dense<0> : vector<8xi32>
    %287 = vector.multi_reduction <add>, %286, %cst_73 [1] : vector<8x128xi32> to vector<8xi32>
    %288 = vector.shape_cast %287 : vector<8xi32> to vector<8x1xi32>
    %289 = arith.cmpi sge, %288, %19 : vector<8x1xi32>
    %290 = arith.select %289, %282, %278 : vector<8x1xi1>, vector<8x1xi32>
    %c22_i32 = arith.constant 22 : i32
    %c30_i32_74 = arith.constant 30 : i32
    %291 = arith.subi %c30_i32_74, %c22_i32 : i32
    %c1_i32_75 = arith.constant 1 : i32
    %292 = arith.shli %c1_i32_75, %291 : i32
    %293 = vector.broadcast %292 : i32 to vector<8x1xi32>
    %294 = arith.ori %290, %293 : vector<8x1xi32>
    %295 = vector.broadcast %294 : vector<8x1xi32> to vector<8x128xi32>
    %296 = arith.cmpi sge, %25, %295 : vector<8x128xi32>
    %297 = arith.andi %9, %296 : vector<8x128xi1>
    %298 = arith.extui %297 : vector<8x128xi1> to vector<8x128xi32>
    %cst_76 = arith.constant dense<0> : vector<8xi32>
    %299 = vector.multi_reduction <add>, %298, %cst_76 [1] : vector<8x128xi32> to vector<8xi32>
    %300 = vector.shape_cast %299 : vector<8xi32> to vector<8x1xi32>
    %301 = arith.cmpi sge, %300, %19 : vector<8x1xi32>
    %302 = arith.select %301, %294, %290 : vector<8x1xi1>, vector<8x1xi32>
    %c23_i32 = arith.constant 23 : i32
    %c30_i32_77 = arith.constant 30 : i32
    %303 = arith.subi %c30_i32_77, %c23_i32 : i32
    %c1_i32_78 = arith.constant 1 : i32
    %304 = arith.shli %c1_i32_78, %303 : i32
    %305 = vector.broadcast %304 : i32 to vector<8x1xi32>
    %306 = arith.ori %302, %305 : vector<8x1xi32>
    %307 = vector.broadcast %306 : vector<8x1xi32> to vector<8x128xi32>
    %308 = arith.cmpi sge, %25, %307 : vector<8x128xi32>
    %309 = arith.andi %9, %308 : vector<8x128xi1>
    %310 = arith.extui %309 : vector<8x128xi1> to vector<8x128xi32>
    %cst_79 = arith.constant dense<0> : vector<8xi32>
    %311 = vector.multi_reduction <add>, %310, %cst_79 [1] : vector<8x128xi32> to vector<8xi32>
    %312 = vector.shape_cast %311 : vector<8xi32> to vector<8x1xi32>
    %313 = arith.cmpi sge, %312, %19 : vector<8x1xi32>
    %314 = arith.select %313, %306, %302 : vector<8x1xi1>, vector<8x1xi32>
    %c24_i32 = arith.constant 24 : i32
    %c30_i32_80 = arith.constant 30 : i32
    %315 = arith.subi %c30_i32_80, %c24_i32 : i32
    %c1_i32_81 = arith.constant 1 : i32
    %316 = arith.shli %c1_i32_81, %315 : i32
    %317 = vector.broadcast %316 : i32 to vector<8x1xi32>
    %318 = arith.ori %314, %317 : vector<8x1xi32>
    %319 = vector.broadcast %318 : vector<8x1xi32> to vector<8x128xi32>
    %320 = arith.cmpi sge, %25, %319 : vector<8x128xi32>
    %321 = arith.andi %9, %320 : vector<8x128xi1>
    %322 = arith.extui %321 : vector<8x128xi1> to vector<8x128xi32>
    %cst_82 = arith.constant dense<0> : vector<8xi32>
    %323 = vector.multi_reduction <add>, %322, %cst_82 [1] : vector<8x128xi32> to vector<8xi32>
    %324 = vector.shape_cast %323 : vector<8xi32> to vector<8x1xi32>
    %325 = arith.cmpi sge, %324, %19 : vector<8x1xi32>
    %326 = arith.select %325, %318, %314 : vector<8x1xi1>, vector<8x1xi32>
    %c25_i32 = arith.constant 25 : i32
    %c30_i32_83 = arith.constant 30 : i32
    %327 = arith.subi %c30_i32_83, %c25_i32 : i32
    %c1_i32_84 = arith.constant 1 : i32
    %328 = arith.shli %c1_i32_84, %327 : i32
    %329 = vector.broadcast %328 : i32 to vector<8x1xi32>
    %330 = arith.ori %326, %329 : vector<8x1xi32>
    %331 = vector.broadcast %330 : vector<8x1xi32> to vector<8x128xi32>
    %332 = arith.cmpi sge, %25, %331 : vector<8x128xi32>
    %333 = arith.andi %9, %332 : vector<8x128xi1>
    %334 = arith.extui %333 : vector<8x128xi1> to vector<8x128xi32>
    %cst_85 = arith.constant dense<0> : vector<8xi32>
    %335 = vector.multi_reduction <add>, %334, %cst_85 [1] : vector<8x128xi32> to vector<8xi32>
    %336 = vector.shape_cast %335 : vector<8xi32> to vector<8x1xi32>
    %337 = arith.cmpi sge, %336, %19 : vector<8x1xi32>
    %338 = arith.select %337, %330, %326 : vector<8x1xi1>, vector<8x1xi32>
    %c26_i32 = arith.constant 26 : i32
    %c30_i32_86 = arith.constant 30 : i32
    %339 = arith.subi %c30_i32_86, %c26_i32 : i32
    %c1_i32_87 = arith.constant 1 : i32
    %340 = arith.shli %c1_i32_87, %339 : i32
    %341 = vector.broadcast %340 : i32 to vector<8x1xi32>
    %342 = arith.ori %338, %341 : vector<8x1xi32>
    %343 = vector.broadcast %342 : vector<8x1xi32> to vector<8x128xi32>
    %344 = arith.cmpi sge, %25, %343 : vector<8x128xi32>
    %345 = arith.andi %9, %344 : vector<8x128xi1>
    %346 = arith.extui %345 : vector<8x128xi1> to vector<8x128xi32>
    %cst_88 = arith.constant dense<0> : vector<8xi32>
    %347 = vector.multi_reduction <add>, %346, %cst_88 [1] : vector<8x128xi32> to vector<8xi32>
    %348 = vector.shape_cast %347 : vector<8xi32> to vector<8x1xi32>
    %349 = arith.cmpi sge, %348, %19 : vector<8x1xi32>
    %350 = arith.select %349, %342, %338 : vector<8x1xi1>, vector<8x1xi32>
    %c27_i32 = arith.constant 27 : i32
    %c30_i32_89 = arith.constant 30 : i32
    %351 = arith.subi %c30_i32_89, %c27_i32 : i32
    %c1_i32_90 = arith.constant 1 : i32
    %352 = arith.shli %c1_i32_90, %351 : i32
    %353 = vector.broadcast %352 : i32 to vector<8x1xi32>
    %354 = arith.ori %350, %353 : vector<8x1xi32>
    %355 = vector.broadcast %354 : vector<8x1xi32> to vector<8x128xi32>
    %356 = arith.cmpi sge, %25, %355 : vector<8x128xi32>
    %357 = arith.andi %9, %356 : vector<8x128xi1>
    %358 = arith.extui %357 : vector<8x128xi1> to vector<8x128xi32>
    %cst_91 = arith.constant dense<0> : vector<8xi32>
    %359 = vector.multi_reduction <add>, %358, %cst_91 [1] : vector<8x128xi32> to vector<8xi32>
    %360 = vector.shape_cast %359 : vector<8xi32> to vector<8x1xi32>
    %361 = arith.cmpi sge, %360, %19 : vector<8x1xi32>
    %362 = arith.select %361, %354, %350 : vector<8x1xi1>, vector<8x1xi32>
    %c28_i32 = arith.constant 28 : i32
    %c30_i32_92 = arith.constant 30 : i32
    %363 = arith.subi %c30_i32_92, %c28_i32 : i32
    %c1_i32_93 = arith.constant 1 : i32
    %364 = arith.shli %c1_i32_93, %363 : i32
    %365 = vector.broadcast %364 : i32 to vector<8x1xi32>
    %366 = arith.ori %362, %365 : vector<8x1xi32>
    %367 = vector.broadcast %366 : vector<8x1xi32> to vector<8x128xi32>
    %368 = arith.cmpi sge, %25, %367 : vector<8x128xi32>
    %369 = arith.andi %9, %368 : vector<8x128xi1>
    %370 = arith.extui %369 : vector<8x128xi1> to vector<8x128xi32>
    %cst_94 = arith.constant dense<0> : vector<8xi32>
    %371 = vector.multi_reduction <add>, %370, %cst_94 [1] : vector<8x128xi32> to vector<8xi32>
    %372 = vector.shape_cast %371 : vector<8xi32> to vector<8x1xi32>
    %373 = arith.cmpi sge, %372, %19 : vector<8x1xi32>
    %374 = arith.select %373, %366, %362 : vector<8x1xi1>, vector<8x1xi32>
    %c29_i32 = arith.constant 29 : i32
    %c30_i32_95 = arith.constant 30 : i32
    %375 = arith.subi %c30_i32_95, %c29_i32 : i32
    %c1_i32_96 = arith.constant 1 : i32
    %376 = arith.shli %c1_i32_96, %375 : i32
    %377 = vector.broadcast %376 : i32 to vector<8x1xi32>
    %378 = arith.ori %374, %377 : vector<8x1xi32>
    %379 = vector.broadcast %378 : vector<8x1xi32> to vector<8x128xi32>
    %380 = arith.cmpi sge, %25, %379 : vector<8x128xi32>
    %381 = arith.andi %9, %380 : vector<8x128xi1>
    %382 = arith.extui %381 : vector<8x128xi1> to vector<8x128xi32>
    %cst_97 = arith.constant dense<0> : vector<8xi32>
    %383 = vector.multi_reduction <add>, %382, %cst_97 [1] : vector<8x128xi32> to vector<8xi32>
    %384 = vector.shape_cast %383 : vector<8xi32> to vector<8x1xi32>
    %385 = arith.cmpi sge, %384, %19 : vector<8x1xi32>
    %386 = arith.select %385, %378, %374 : vector<8x1xi1>, vector<8x1xi32>
    %c30_i32_98 = arith.constant 30 : i32
    %c30_i32_99 = arith.constant 30 : i32
    %387 = arith.subi %c30_i32_99, %c30_i32_98 : i32
    %c1_i32_100 = arith.constant 1 : i32
    %388 = arith.shli %c1_i32_100, %387 : i32
    %389 = vector.broadcast %388 : i32 to vector<8x1xi32>
    %390 = arith.ori %386, %389 : vector<8x1xi32>
    %391 = vector.broadcast %390 : vector<8x1xi32> to vector<8x128xi32>
    %392 = arith.cmpi sge, %25, %391 : vector<8x128xi32>
    %393 = arith.andi %9, %392 : vector<8x128xi1>
    %394 = arith.extui %393 : vector<8x128xi1> to vector<8x128xi32>
    %cst_101 = arith.constant dense<0> : vector<8xi32>
    %395 = vector.multi_reduction <add>, %394, %cst_101 [1] : vector<8x128xi32> to vector<8xi32>
    %396 = vector.shape_cast %395 : vector<8xi32> to vector<8x1xi32>
    %397 = arith.cmpi sge, %396, %19 : vector<8x1xi32>
    %398 = arith.select %397, %390, %386 : vector<8x1xi1>, vector<8x1xi32>
    %c31_i32 = arith.constant 31 : i32
    %399 = vector.broadcast %398 : vector<8x1xi32> to vector<8x128xi32>
    %400 = arith.cmpi sge, %25, %399 : vector<8x128xi32>
    %401 = arith.andi %9, %400 : vector<8x128xi1>
    %c0_i32_102 = arith.constant 0 : i32
    %402 = vector.broadcast %c0_i32_102 : i32 to vector<8x1xi32>
    %403 = arith.cmpi sgt, %19, %402 : vector<8x1xi32>
    %404 = vector.broadcast %403 : vector<8x1xi1> to vector<8x128xi1>
    %405 = arith.andi %401, %404 : vector<8x128xi1>
    %c103_i32_103 = arith.constant 103 : i32
    %406 = vector.broadcast %c103_i32_103 : i32 to vector<8x128xi32>
    %407 = arith.select %405, %406, %0 : vector<8x128xi1>, vector<8x128xi32>
    %c0_104 = arith.constant 0 : index
    %c0_105 = arith.constant 0 : index
    %408 = vector.load %arg3[%c0_104, %c0_105] : memref<8x128xi32, #tpu.memory_space<vmem>>, vector<8x128xi32>
    tpu.vector_store %arg3[%c0_104, %c0_105], %407 {strides = array<i32>} : memref<8x128xi32, #tpu.memory_space<vmem>>, vector<8x128xi32>,
    return
  }
  func.func @transform_0(%arg0: i32) -> (i32, i32) {
    %c0_i32 = arith.constant 0 : i32
    %c0_i32_0 = arith.constant 0 : i32
    return %arg0, %c0_i32 : i32, i32
  }
  func.func @transform_1(%arg0: i32) -> (i32, i32) {
    %c0_i32 = arith.constant 0 : i32
    %c0_i32_0 = arith.constant 0 : i32
    return %arg0, %c0_i32 : i32, i32
  }
  func.func @transform_2(%arg0: i32) -> (i32, i32) {
    %c0_i32 = arith.constant 0 : i32
    %c0_i32_0 = arith.constant 0 : i32
    return %arg0, %c0_i32 : i32, i32
  }
}

</mosaic_0001>

<bundles_post_ra>
// kernel: tpu_custom_call.1
= control target key start
LH: loop header
LB: loop body
LE: loop exit
PB: predicated region body
PF: predicated region fallthrough
CT: control target
= control target key end

     0   :  { %7 = vsyncpa [#allocation3], 0  ;;  %s949_s0 = inlined_call_operand.hbm [shape: s32[8,128], index: 0, kind: input, shape index: {}]   ;;  %s950_s1 = inlined_call_operand.hbm [shape: s32[8,128], index: 1, kind: input, shape index: {}]   ;;  %s951_s2 = inlined_call_operand.hbm [shape: s32[8,128], index: 2, kind: output, shape index: {}]  }
   0x1   :  { %8 = vsyncpa [#allocation6], 0 }
   0x2   :  { %9 = vsyncpa [#allocation4], 0  ;;  %s725_s9 = smov [#allocation2]   ;;  %s726_s11 = smov [#allocation5]  }
   0x3   :  { %s16_s10 = sshll.u32 %s725_s9, 4  ;;  %s26_s12 = sshll.u32 %s726_s11, 4  ;;  %s17_s10 = int_to_ptr.vmem [resolvable:$true] %s16_s10  ;;  %s27_s12 = int_to_ptr.vmem [resolvable:$true] %s26_s12 }
   0x4   :  { %s653_s15 = scalar_lea.hbm %s949_s0, 128 }
   0x5   :  { %p654_p0 = scmp.ne.s32.totalorder %s949_s0, %s653_s15  ;;  %p657_p1 = scmp.lt.u32.totalorder %s653_s15, %s949_s0 }
   0x7   :  { %p659_p2 = pnand %p657_p1, %p654_p0 }
   0x9   :  { %662 = shalt.err (!%p659_p2)
}
   0xa   :  { %s663_s20 = scalar_lea.vmem %s17_s10, 128  ;;  %p668_p4 = scmp.lt.s32.totalorder %s17_s10, %s17_s10 }
   0xb   :  { %p664_p3 = scmp.ne.s32.totalorder %s17_s10, %s663_s20  ;;  %p669_p5 = scmp.lt.s32.totalorder %s663_s20, %s663_s20 }
   0xd   :  { %p670_p6 = por %p669_p5, %p668_p4 }
   0xf   :  { %p671_p7 = pnand %p670_p6, %p664_p3 }
  0x11   :  { %674 = shalt.err (!%p671_p7)
}
  0x12   :  { %19 = dma.hbm_to_vmem [thread:$0]  %s949_s0, 128, %s17_s10, [#allocation3]  }
  0x13   :  { %s675_s25 = scalar_lea.hbm %s950_s1, 128 }
  0x14   :  { %p676_p8 = scmp.ne.s32.totalorder %s950_s1, %s675_s25  ;;  %p679_p9 = scmp.lt.u32.totalorder %s675_s25, %s950_s1 }
  0x16   :  { %p681_p10 = pnand %p679_p9, %p676_p8 }
  0x18   :  { %684 = shalt.err (!%p681_p10)
}
  0x19   :  { %s685_s30 = scalar_lea.vmem %s27_s12, 128  ;;  %p690_p12 = scmp.lt.s32.totalorder %s27_s12, %s27_s12 }
  0x1a   :  { %p686_p11 = scmp.ne.s32.totalorder %s27_s12, %s685_s30  ;;  %p691_p13 = scmp.lt.s32.totalorder %s685_s30, %s685_s30 }
  0x1c   :  { %p692_p0 = por %p691_p13, %p690_p12 }
  0x1e   :  { %p693_p1 = pnand %p692_p0, %p686_p11 }
  0x20   :  { %696 = shalt.err (!%p693_p1)
}
  0x21   :  { %29 = dma.hbm_to_vmem [thread:$0]  %s950_s1, 128, %s27_s12, [#allocation6]  }
  0x22   :  { %719 = dma.done.wait [#allocation3], 128  }
  0x23   :  { %720 = vsyncadd [#allocation3], 4294967168 }
  0x24   :  { %721 = dma.done.wait [#allocation6], 128  }
  0x25   :  { %722 = vsyncadd [#allocation6], 4294967168  ;;  %v60_v0 = vlaneseq  ;;  %v37_v1 = vld [vmem:[#allocation5] sm:$0xff]  ;;  %v36_v3 = vld [vmem:[#allocation2] sm:$0xff]  ;;  %v727_v5 = vmov 0   ;;  %s728_s1 = smov [#allocation7]  }
  0x26   :  { %v62_v4 = vshra.s32 %v37_v1, 7  ;;  %vm38_vm0 = vcmp.ne.s32.totalorder %v36_v3, 0  ;;  %vm39_vm1 = vcmp.lt.s32.totalorder %v36_v3, 101  ;;  %vm40_vm2 = vcmp.gt.s32.totalorder %v36_v3, 103  ;;  %s636_s4 = sshll.u32 %s728_s1, 4  ;;  %s637_s4 = int_to_ptr.vmem [resolvable:$true] %s636_s4 }
  0x27   :  { %v61_v2 = vand.u32 127, %v60_v0  ;;  %vm41_vm3 = vmor %vm39_vm1, %vm40_vm2  ;;  %v43_v6 = vsel %vm38_vm0, 1, %v727_v5  ;;  %s697_s5 = scalar_lea.vmem %s637_s4, 128  ;;  %p702_p3 = scmp.lt.s32.totalorder %s637_s4, %s637_s4 }
  0x28   :  { %v63_v7 = vshll.u32 %v62_v4, 7  ;;  %v45_v8 = vshrl.u32 %v43_v6, 16  ;;  %v44_v9 = vand.u32 65535, %v43_v6  ;;  %vm771_vm4 = vmand %vm38_vm0, %vm41_vm3  ;;  %p698_p2 = scmp.ne.s32.totalorder %s637_s4, %s697_s5  ;;  %p703_p4 = scmp.lt.s32.totalorder %s697_s5, %s697_s5 }
  0x2a   :  { %v769_v10 = vor.u32 %v63_v7, %v61_v2  ;;  %v47_v11 = vcvt.s32.f32 %v45_v8  ;;  %v46_v13 = vcvt.s32.f32 %v44_v9  ;;  %p704_p5 = por %p703_p4, %p702_p3 }
  0x2c   :  { %50 = vadd.xlane.f32.xlu0 %v47_v11  ;;  %vm65_vm5 = vcmp.ge.s32.totalorder %v769_v10, 1073741824  ;;  %p705_p6 = pnand %p704_p5, %p698_p2 }
  0x2d   :  { %vm66_vm6 = vmand %vm771_vm4, %vm65_vm5 }
  0x2e   :  { %v67_v14 = vsel %vm66_vm6, 1, %v727_v5 }
  0x2f   :  { %v69_v15 = vshrl.u32 %v67_v14, 16  ;;  %v68_v16 = vand.u32 65535, %v67_v14 }
  0x30   :  { %48 = vadd.xlane.f32.xlu0 %v46_v13 }
  0x31   :  { %v71_v17 = vcvt.s32.f32 %v69_v15  ;;  %v70_v18 = vcvt.s32.f32 %v68_v16 }
  0x33   :  { %74 = vadd.xlane.f32.xlu1 %v71_v17 }
  0x37   :  { %72 = vadd.xlane.f32.xlu1 %v70_v18 }
  0xb9   :  { %v51_v19 = vpop.xlane.xlu0 %50 }
  0xba   :  { %v53_v20 = vcvt.f32.s32 %v51_v19 }
  0xbc   :  { %v54_v22 = vshll.u32 %v53_v20, 16 }
  0xbd   :  { %v49_v21 = vpop.xlane.xlu0 %48 }
  0xbe   :  { %v52_v23 = vcvt.f32.s32 %v49_v21 }
  0xc0   :  { %v55_v24 = vadd.s32 %v54_v22, %v52_v23  ;;  %v75_v25 = vpop.xlane.xlu1 %74 }
  0xc1   :  { %v77_v27 = vcvt.f32.s32 %v75_v25 }
  0xc2   :  { %v56_v26 = vcvt.s32.f32 %v55_v24 }
  0xc3   :  { %v78_v31 = vshll.u32 %v77_v27, 16 }
  0xc4   :  { %v57_v28 = vmul.f32 0.1, %v56_v26  ;;  %v73_v29 = vpop.xlane.xlu1 %72 }
  0xc5   :  { %v76_v32 = vcvt.f32.s32 %v73_v29 }
  0xc6   :  { %v58_v30 = vfloor.f32 %v57_v28 }
  0xc7   :  { %v79_v35 = vadd.s32 %v78_v31, %v76_v32 }
  0xc8   :  { %v646_v33 = vtrunc.f32 %v58_v30 }
  0xca   :  { %v779_v34 = vcvt.f32.s32 %v646_v33 }
  0xcc   :  { %vm80_vm7 = vcmp.ge.s32.totalorder %v79_v35, %v779_v34 }
  0xcd   :  { %v81_v36 = vsel %vm80_vm7, 1073741824, %v727_v5 }
  0xce   :  { %v82_v37 = vor.u32 536870912, %v81_v36 }
  0xd0   :  { %vm83_vm8 = vcmp.ge.s32.totalorder %v769_v10, %v82_v37 }
  0xd1   :  { %vm84_vm9 = vmand %vm771_vm4, %vm83_vm8 }
  0xd2   :  { %v85_v38 = vsel %vm84_vm9, 1, %v727_v5 }
  0xd3   :  { %v87_v39 = vshrl.u32 %v85_v38, 16  ;;  %v86_v40 = vand.u32 65535, %v85_v38 }
  0xd5   :  { %v89_v41 = vcvt.s32.f32 %v87_v39  ;;  %v88_v42 = vcvt.s32.f32 %v86_v40 }
  0xd7   :  { %92 = vadd.xlane.f32.xlu0 %v89_v41  ;;  %90 = vadd.xlane.f32.xlu1 %v88_v42 }
 0x164   :  { %v93_v43 = vpop.xlane.xlu0 %92  ;;  %v91_v44 = vpop.xlane.xlu1 %90 }
 0x165   :  { %v95_v45 = vcvt.f32.s32 %v93_v43  ;;  %v94_v47 = vcvt.f32.s32 %v91_v44 }
 0x167   :  { %v96_v46 = vshll.u32 %v95_v45, 16 }
 0x169   :  { %v97_v48 = vadd.s32 %v96_v46, %v94_v47 }
 0x16b   :  { %vm98_vm10 = vcmp.ge.s32.totalorder %v97_v48, %v779_v34 }
 0x16c   :  { %v99_v49 = vsel %vm98_vm10, %v82_v37, %v81_v36 }
 0x16d   :  { %v100_v50 = vor.u32 268435456, %v99_v49 }
 0x16f   :  { %vm101_vm11 = vcmp.ge.s32.totalorder %v769_v10, %v100_v50 }
 0x170   :  { %vm102_vm12 = vmand %vm771_vm4, %vm101_vm11 }
 0x171   :  { %v103_v51 = vsel %vm102_vm12, 1, %v727_v5 }
 0x172   :  { %v105_v52 = vshrl.u32 %v103_v51, 16  ;;  %v104_v53 = vand.u32 65535, %v103_v51 }
 0x174   :  { %v107_v54 = vcvt.s32.f32 %v105_v52  ;;  %v106_v55 = vcvt.s32.f32 %v104_v53 }
 0x176   :  { %110 = vadd.xlane.f32.xlu0 %v107_v54  ;;  %108 = vadd.xlane.f32.xlu1 %v106_v55 }
 0x203   :  { %v111_v56 = vpop.xlane.xlu0 %110  ;;  %v109_v57 = vpop.xlane.xlu1 %108 }
 0x204   :  { %v113_v58 = vcvt.f32.s32 %v111_v56  ;;  %v112_v60 = vcvt.f32.s32 %v109_v57 }
 0x206   :  { %v114_v59 = vshll.u32 %v113_v58, 16 }
 0x208   :  { %v115_v61 = vadd.s32 %v114_v59, %v112_v60 }
 0x20a   :  { %vm116_vm13 = vcmp.ge.s32.totalorder %v115_v61, %v779_v34 }
 0x20b   :  { %v117_v62 = vsel %vm116_vm13, %v100_v50, %v99_v49 }
 0x20c   :  { %v118_v63 = vor.u32 134217728, %v117_v62 }
 0x20e   :  { %vm119_vm14 = vcmp.ge.s32.totalorder %v769_v10, %v118_v63 }
 0x20f   :  { %vm120_vm15 = vmand %vm771_vm4, %vm119_vm14 }
 0x210   :  { %v121_v0 = vsel %vm120_vm15, 1, %v727_v5 }
 0x211   :  { %v123_v1 = vshrl.u32 %v121_v0, 16  ;;  %v122_v2 = vand.u32 65535, %v121_v0 }
 0x213   :  { %v125_v3 = vcvt.s32.f32 %v123_v1  ;;  %v124_v4 = vcvt.s32.f32 %v122_v2 }
 0x215   :  { %128 = vadd.xlane.f32.xlu0 %v125_v3  ;;  %126 = vadd.xlane.f32.xlu1 %v124_v4 }
 0x2a2   :  { %v129_v6 = vpop.xlane.xlu0 %128  ;;  %v127_v7 = vpop.xlane.xlu1 %126 }
 0x2a3   :  { %v131_v8 = vcvt.f32.s32 %v129_v6  ;;  %v130_v11 = vcvt.f32.s32 %v127_v7 }
 0x2a5   :  { %v132_v9 = vshll.u32 %v131_v8, 16 }
 0x2a7   :  { %v133_v13 = vadd.s32 %v132_v9, %v130_v11 }
 0x2a9   :  { %vm134_vm0 = vcmp.ge.s32.totalorder %v133_v13, %v779_v34 }
 0x2aa   :  { %v135_v14 = vsel %vm134_vm0, %v118_v63, %v117_v62 }
 0x2ab   :  { %v136_v15 = vor.u32 67108864, %v135_v14 }
 0x2ad   :  { %vm137_vm1 = vcmp.ge.s32.totalorder %v769_v10, %v136_v15 }
 0x2ae   :  { %vm138_vm2 = vmand %vm771_vm4, %vm137_vm1 }
 0x2af   :  { %v139_v16 = vsel %vm138_vm2, 1, %v727_v5 }
 0x2b0   :  { %v141_v17 = vshrl.u32 %v139_v16, 16  ;;  %v140_v18 = vand.u32 65535, %v139_v16 }
 0x2b2   :  { %v143_v19 = vcvt.s32.f32 %v141_v17  ;;  %v142_v20 = vcvt.s32.f32 %v140_v18 }
 0x2b4   :  { %146 = vadd.xlane.f32.xlu0 %v143_v19  ;;  %144 = vadd.xlane.f32.xlu1 %v142_v20 }
 0x341   :  { %v147_v21 = vpop.xlane.xlu0 %146  ;;  %v145_v22 = vpop.xlane.xlu1 %144 }
 0x342   :  { %v149_v23 = vcvt.f32.s32 %v147_v21  ;;  %v148_v25 = vcvt.f32.s32 %v145_v22 }
 0x344   :  { %v150_v24 = vshll.u32 %v149_v23, 16 }
 0x346   :  { %v151_v26 = vadd.s32 %v150_v24, %v148_v25 }
 0x348   :  { %vm152_vm3 = vcmp.ge.s32.totalorder %v151_v26, %v779_v34 }
 0x349   :  { %v153_v27 = vsel %vm152_vm3, %v136_v15, %v135_v14 }
 0x34a   :  { %v154_v28 = vor.u32 33554432, %v153_v27 }
 0x34c   :  { %vm155_vm5 = vcmp.ge.s32.totalorder %v769_v10, %v154_v28 }
 0x34d   :  { %vm156_vm6 = vmand %vm771_vm4, %vm155_vm5 }
 0x34e   :  { %v157_v29 = vsel %vm156_vm6, 1, %v727_v5 }
 0x34f   :  { %v159_v30 = vshrl.u32 %v157_v29, 16  ;;  %v158_v31 = vand.u32 65535, %v157_v29 }
 0x351   :  { %v161_v32 = vcvt.s32.f32 %v159_v30  ;;  %v160_v33 = vcvt.s32.f32 %v158_v31 }
 0x353   :  { %164 = vadd.xlane.f32.xlu0 %v161_v32  ;;  %162 = vadd.xlane.f32.xlu1 %v160_v33 }
 0x3e0   :  { %v165_v35 = vpop.xlane.xlu0 %164  ;;  %v163_v36 = vpop.xlane.xlu1 %162 }
 0x3e1   :  { %v167_v37 = vcvt.f32.s32 %v165_v35  ;;  %v166_v39 = vcvt.f32.s32 %v163_v36 }
 0x3e3   :  { %v168_v38 = vshll.u32 %v167_v37, 16 }
 0x3e5   :  { %v169_v40 = vadd.s32 %v168_v38, %v166_v39 }
 0x3e7   :  { %vm170_vm7 = vcmp.ge.s32.totalorder %v169_v40, %v779_v34 }
 0x3e8   :  { %v171_v41 = vsel %vm170_vm7, %v154_v28, %v153_v27 }
 0x3e9   :  { %v172_v42 = vor.u32 16777216, %v171_v41 }
 0x3eb   :  { %vm173_vm8 = vcmp.ge.s32.totalorder %v769_v10, %v172_v42 }
 0x3ec   :  { %vm174_vm9 = vmand %vm771_vm4, %vm173_vm8 }
 0x3ed   :  { %v175_v43 = vsel %vm174_vm9, 1, %v727_v5 }
 0x3ee   :  { %v177_v44 = vshrl.u32 %v175_v43, 16  ;;  %v176_v45 = vand.u32 65535, %v175_v43 }
 0x3f0   :  { %v179_v46 = vcvt.s32.f32 %v177_v44  ;;  %v178_v47 = vcvt.s32.f32 %v176_v45 }
 0x3f2   :  { %182 = vadd.xlane.f32.xlu0 %v179_v46  ;;  %180 = vadd.xlane.f32.xlu1 %v178_v47 }
 0x47f   :  { %v183_v48 = vpop.xlane.xlu0 %182  ;;  %v181_v49 = vpop.xlane.xlu1 %180 }
 0x480   :  { %v185_v50 = vcvt.f32.s32 %v183_v48  ;;  %v184_v52 = vcvt.f32.s32 %v181_v49 }
 0x482   :  { %v186_v51 = vshll.u32 %v185_v50, 16 }
 0x484   :  { %v187_v53 = vadd.s32 %v186_v51, %v184_v52 }
 0x486   :  { %vm188_vm10 = vcmp.ge.s32.totalorder %v187_v53, %v779_v34 }
 0x487   :  { %v189_v54 = vsel %vm188_vm10, %v172_v42, %v171_v41 }
 0x488   :  { %v190_v55 = vor.u32 8388608, %v189_v54 }
 0x48a   :  { %vm191_vm11 = vcmp.ge.s32.totalorder %v769_v10, %v190_v55 }
 0x48b   :  { %vm192_vm12 = vmand %vm771_vm4, %vm191_vm11 }
 0x48c   :  { %v193_v56 = vsel %vm192_vm12, 1, %v727_v5 }
 0x48d   :  { %v195_v57 = vshrl.u32 %v193_v56, 16  ;;  %v194_v58 = vand.u32 65535, %v193_v56 }
 0x48f   :  { %v197_v59 = vcvt.s32.f32 %v195_v57  ;;  %v196_v60 = vcvt.s32.f32 %v194_v58 }
 0x491   :  { %200 = vadd.xlane.f32.xlu0 %v197_v59  ;;  %198 = vadd.xlane.f32.xlu1 %v196_v60 }
 0x51e   :  { %v201_v61 = vpop.xlane.xlu0 %200  ;;  %v199_v62 = vpop.xlane.xlu1 %198 }
 0x51f   :  { %v203_v63 = vcvt.f32.s32 %v201_v61  ;;  %v202_v1 = vcvt.f32.s32 %v199_v62 }
 0x521   :  { %v204_v0 = vshll.u32 %v203_v63, 16 }
 0x523   :  { %v205_v2 = vadd.s32 %v204_v0, %v202_v1 }
 0x525   :  { %vm206_vm13 = vcmp.ge.s32.totalorder %v205_v2, %v779_v34 }
 0x526   :  { %v207_v3 = vsel %vm206_vm13, %v190_v55, %v189_v54 }
 0x527   :  { %v208_v4 = vor.u32 4194304, %v207_v3 }
 0x529   :  { %vm209_vm14 = vcmp.ge.s32.totalorder %v769_v10, %v208_v4 }
 0x52a   :  { %vm210_vm15 = vmand %vm771_vm4, %vm209_vm14 }
 0x52b   :  { %v211_v6 = vsel %vm210_vm15, 1, %v727_v5 }
 0x52c   :  { %v213_v7 = vshrl.u32 %v211_v6, 16  ;;  %v212_v8 = vand.u32 65535, %v211_v6 }
 0x52e   :  { %v215_v9 = vcvt.s32.f32 %v213_v7  ;;  %v214_v11 = vcvt.s32.f32 %v212_v8 }
 0x530   :  { %218 = vadd.xlane.f32.xlu0 %v215_v9  ;;  %216 = vadd.xlane.f32.xlu1 %v214_v11 }
 0x5bd   :  { %v219_v13 = vpop.xlane.xlu0 %218  ;;  %v217_v14 = vpop.xlane.xlu1 %216 }
 0x5be   :  { %v221_v15 = vcvt.f32.s32 %v219_v13  ;;  %v220_v17 = vcvt.f32.s32 %v217_v14 }
 0x5c0   :  { %v222_v16 = vshll.u32 %v221_v15, 16 }
 0x5c2   :  { %v223_v18 = vadd.s32 %v222_v16, %v220_v17 }
 0x5c4   :  { %vm224_vm0 = vcmp.ge.s32.totalorder %v223_v18, %v779_v34 }
 0x5c5   :  { %v225_v19 = vsel %vm224_vm0, %v208_v4, %v207_v3 }
 0x5c6   :  { %v226_v20 = vor.u32 2097152, %v225_v19 }
 0x5c8   :  { %vm227_vm1 = vcmp.ge.s32.totalorder %v769_v10, %v226_v20 }
 0x5c9   :  { %vm228_vm2 = vmand %vm771_vm4, %vm227_vm1 }
 0x5ca   :  { %v229_v21 = vsel %vm228_vm2, 1, %v727_v5 }
 0x5cb   :  { %v231_v22 = vshrl.u32 %v229_v21, 16  ;;  %v230_v23 = vand.u32 65535, %v229_v21 }
 0x5cd   :  { %v233_v24 = vcvt.s32.f32 %v231_v22  ;;  %v232_v25 = vcvt.s32.f32 %v230_v23 }
 0x5cf   :  { %236 = vadd.xlane.f32.xlu0 %v233_v24  ;;  %234 = vadd.xlane.f32.xlu1 %v232_v25 }
 0x65c   :  { %v237_v26 = vpop.xlane.xlu0 %236  ;;  %v235_v27 = vpop.xlane.xlu1 %234 }
 0x65d   :  { %v239_v28 = vcvt.f32.s32 %v237_v26  ;;  %v238_v30 = vcvt.f32.s32 %v235_v27 }
 0x65f   :  { %v240_v29 = vshll.u32 %v239_v28, 16 }
 0x661   :  { %v241_v31 = vadd.s32 %v240_v29, %v238_v30 }
 0x663   :  { %vm242_vm3 = vcmp.ge.s32.totalorder %v241_v31, %v779_v34 }
 0x664   :  { %v243_v32 = vsel %vm242_vm3, %v226_v20, %v225_v19 }
 0x665   :  { %v244_v33 = vor.u32 1048576, %v243_v32 }
 0x667   :  { %vm245_vm5 = vcmp.ge.s32.totalorder %v769_v10, %v244_v33 }
 0x668   :  { %vm246_vm6 = vmand %vm771_vm4, %vm245_vm5 }
 0x669   :  { %v247_v35 = vsel %vm246_vm6, 1, %v727_v5 }
 0x66a   :  { %v249_v36 = vshrl.u32 %v247_v35, 16  ;;  %v248_v37 = vand.u32 65535, %v247_v35 }
 0x66c   :  { %v251_v38 = vcvt.s32.f32 %v249_v36  ;;  %v250_v39 = vcvt.s32.f32 %v248_v37 }
 0x66e   :  { %254 = vadd.xlane.f32.xlu0 %v251_v38  ;;  %252 = vadd.xlane.f32.xlu1 %v250_v39 }
 0x6fb   :  { %v255_v40 = vpop.xlane.xlu0 %254  ;;  %v253_v41 = vpop.xlane.xlu1 %252 }
 0x6fc   :  { %v257_v42 = vcvt.f32.s32 %v255_v40  ;;  %v256_v44 = vcvt.f32.s32 %v253_v41 }
 0x6fe   :  { %v258_v43 = vshll.u32 %v257_v42, 16 }
 0x700   :  { %v259_v45 = vadd.s32 %v258_v43, %v256_v44 }
 0x702   :  { %vm260_vm7 = vcmp.ge.s32.totalorder %v259_v45, %v779_v34 }
 0x703   :  { %v261_v46 = vsel %vm260_vm7, %v244_v33, %v243_v32 }
 0x704   :  { %v262_v47 = vor.u32 524288, %v261_v46 }
 0x706   :  { %vm263_vm8 = vcmp.ge.s32.totalorder %v769_v10, %v262_v47 }
 0x707   :  { %vm264_vm9 = vmand %vm771_vm4, %vm263_vm8 }
 0x708   :  { %v265_v48 = vsel %vm264_vm9, 1, %v727_v5 }
 0x709   :  { %v267_v49 = vshrl.u32 %v265_v48, 16  ;;  %v266_v50 = vand.u32 65535, %v265_v48 }
 0x70b   :  { %v269_v51 = vcvt.s32.f32 %v267_v49  ;;  %v268_v52 = vcvt.s32.f32 %v266_v50 }
 0x70d   :  { %272 = vadd.xlane.f32.xlu0 %v269_v51  ;;  %270 = vadd.xlane.f32.xlu1 %v268_v52 }
 0x79a   :  { %v273_v53 = vpop.xlane.xlu0 %272  ;;  %v271_v54 = vpop.xlane.xlu1 %270 }
 0x79b   :  { %v275_v55 = vcvt.f32.s32 %v273_v53  ;;  %v274_v57 = vcvt.f32.s32 %v271_v54 }
 0x79d   :  { %v276_v56 = vshll.u32 %v275_v55, 16 }
 0x79f   :  { %v277_v58 = vadd.s32 %v276_v56, %v274_v57 }
 0x7a1   :  { %vm278_vm10 = vcmp.ge.s32.totalorder %v277_v58, %v779_v34 }
 0x7a2   :  { %v279_v59 = vsel %vm278_vm10, %v262_v47, %v261_v46 }
 0x7a3   :  { %v280_v60 = vor.u32 262144, %v279_v59 }
 0x7a5   :  { %vm281_vm11 = vcmp.ge.s32.totalorder %v769_v10, %v280_v60 }
 0x7a6   :  { %vm282_vm12 = vmand %vm771_vm4, %vm281_vm11 }
 0x7a7   :  { %v283_v61 = vsel %vm282_vm12, 1, %v727_v5 }
 0x7a8   :  { %v285_v62 = vshrl.u32 %v283_v61, 16  ;;  %v284_v63 = vand.u32 65535, %v283_v61 }
 0x7aa   :  { %v287_v0 = vcvt.s32.f32 %v285_v62  ;;  %v286_v1 = vcvt.s32.f32 %v284_v63 }
 0x7ac   :  { %290 = vadd.xlane.f32.xlu0 %v287_v0  ;;  %288 = vadd.xlane.f32.xlu1 %v286_v1 }
 0x839   :  { %v291_v2 = vpop.xlane.xlu0 %290  ;;  %v289_v3 = vpop.xlane.xlu1 %288 }
 0x83a   :  { %v293_v4 = vcvt.f32.s32 %v291_v2  ;;  %v292_v7 = vcvt.f32.s32 %v289_v3 }
 0x83c   :  { %v294_v6 = vshll.u32 %v293_v4, 16 }
 0x83e   :  { %v295_v8 = vadd.s32 %v294_v6, %v292_v7 }
 0x840   :  { %vm296_vm13 = vcmp.ge.s32.totalorder %v295_v8, %v779_v34 }
 0x841   :  { %v297_v9 = vsel %vm296_vm13, %v280_v60, %v279_v59 }
 0x842   :  { %v298_v11 = vor.u32 131072, %v297_v9 }
 0x844   :  { %vm299_vm14 = vcmp.ge.s32.totalorder %v769_v10, %v298_v11 }
 0x845   :  { %vm300_vm15 = vmand %vm771_vm4, %vm299_vm14 }
 0x846   :  { %v301_v13 = vsel %vm300_vm15, 1, %v727_v5 }
 0x847   :  { %v303_v14 = vshrl.u32 %v301_v13, 16  ;;  %v302_v15 = vand.u32 65535, %v301_v13 }
 0x849   :  { %v305_v16 = vcvt.s32.f32 %v303_v14  ;;  %v304_v17 = vcvt.s32.f32 %v302_v15 }
 0x84b   :  { %308 = vadd.xlane.f32.xlu0 %v305_v16  ;;  %306 = vadd.xlane.f32.xlu1 %v304_v17 }
 0x8d8   :  { %v309_v18 = vpop.xlane.xlu0 %308  ;;  %v307_v19 = vpop.xlane.xlu1 %306 }
 0x8d9   :  { %v311_v20 = vcvt.f32.s32 %v309_v18  ;;  %v310_v22 = vcvt.f32.s32 %v307_v19 }
 0x8db   :  { %v312_v21 = vshll.u32 %v311_v20, 16 }
 0x8dd   :  { %v313_v23 = vadd.s32 %v312_v21, %v310_v22 }
 0x8df   :  { %vm314_vm0 = vcmp.ge.s32.totalorder %v313_v23, %v779_v34 }
 0x8e0   :  { %v315_v24 = vsel %vm314_vm0, %v298_v11, %v297_v9 }
 0x8e1   :  { %v316_v25 = vor.u32 65536, %v315_v24 }
 0x8e3   :  { %vm317_vm1 = vcmp.ge.s32.totalorder %v769_v10, %v316_v25 }
 0x8e4   :  { %vm318_vm2 = vmand %vm771_vm4, %vm317_vm1 }
 0x8e5   :  { %v319_v26 = vsel %vm318_vm2, 1, %v727_v5 }
 0x8e6   :  { %v321_v27 = vshrl.u32 %v319_v26, 16  ;;  %v320_v28 = vand.u32 65535, %v319_v26 }
 0x8e8   :  { %v323_v29 = vcvt.s32.f32 %v321_v27  ;;  %v322_v30 = vcvt.s32.f32 %v320_v28 }
 0x8ea   :  { %326 = vadd.xlane.f32.xlu0 %v323_v29  ;;  %324 = vadd.xlane.f32.xlu1 %v322_v30 }
 0x977   :  { %v327_v31 = vpop.xlane.xlu0 %326  ;;  %v325_v32 = vpop.xlane.xlu1 %324 }
 0x978   :  { %v329_v33 = vcvt.f32.s32 %v327_v31  ;;  %v328_v36 = vcvt.f32.s32 %v325_v32 }
 0x97a   :  { %v330_v35 = vshll.u32 %v329_v33, 16 }
 0x97c   :  { %v331_v37 = vadd.s32 %v330_v35, %v328_v36 }
 0x97e   :  { %vm332_vm3 = vcmp.ge.s32.totalorder %v331_v37, %v779_v34 }
 0x97f   :  { %v333_v38 = vsel %vm332_vm3, %v316_v25, %v315_v24 }
 0x980   :  { %v334_v39 = vor.u32 32768, %v333_v38 }
 0x982   :  { %vm335_vm5 = vcmp.ge.s32.totalorder %v769_v10, %v334_v39 }
 0x983   :  { %vm336_vm6 = vmand %vm771_vm4, %vm335_vm5 }
 0x984   :  { %v337_v40 = vsel %vm336_vm6, 1, %v727_v5 }
 0x985   :  { %v339_v41 = vshrl.u32 %v337_v40, 16  ;;  %v338_v42 = vand.u32 65535, %v337_v40 }
 0x987   :  { %v341_v43 = vcvt.s32.f32 %v339_v41  ;;  %v340_v44 = vcvt.s32.f32 %v338_v42 }
 0x989   :  { %344 = vadd.xlane.f32.xlu0 %v341_v43  ;;  %342 = vadd.xlane.f32.xlu1 %v340_v44 }
 0xa16   :  { %v345_v45 = vpop.xlane.xlu0 %344  ;;  %v343_v46 = vpop.xlane.xlu1 %342 }
 0xa17   :  { %v347_v47 = vcvt.f32.s32 %v345_v45  ;;  %v346_v49 = vcvt.f32.s32 %v343_v46 }
 0xa19   :  { %v348_v48 = vshll.u32 %v347_v47, 16 }
 0xa1b   :  { %v349_v50 = vadd.s32 %v348_v48, %v346_v49 }
 0xa1d   :  { %vm350_vm7 = vcmp.ge.s32.totalorder %v349_v50, %v779_v34 }
 0xa1e   :  { %v351_v51 = vsel %vm350_vm7, %v334_v39, %v333_v38 }
 0xa1f   :  { %v352_v52 = vor.u32 16384, %v351_v51 }
 0xa21   :  { %vm353_vm8 = vcmp.ge.s32.totalorder %v769_v10, %v352_v52 }
 0xa22   :  { %vm354_vm9 = vmand %vm771_vm4, %vm353_vm8 }
 0xa23   :  { %v355_v53 = vsel %vm354_vm9, 1, %v727_v5 }
 0xa24   :  { %v357_v54 = vshrl.u32 %v355_v53, 16  ;;  %v356_v55 = vand.u32 65535, %v355_v53 }
 0xa26   :  { %v359_v56 = vcvt.s32.f32 %v357_v54  ;;  %v358_v57 = vcvt.s32.f32 %v356_v55 }
 0xa28   :  { %362 = vadd.xlane.f32.xlu0 %v359_v56  ;;  %360 = vadd.xlane.f32.xlu1 %v358_v57 }
 0xab5   :  { %v363_v58 = vpop.xlane.xlu0 %362  ;;  %v361_v59 = vpop.xlane.xlu1 %360 }
 0xab6   :  { %v365_v60 = vcvt.f32.s32 %v363_v58  ;;  %v364_v62 = vcvt.f32.s32 %v361_v59 }
 0xab8   :  { %v366_v61 = vshll.u32 %v365_v60, 16 }
 0xaba   :  { %v367_v63 = vadd.s32 %v366_v61, %v364_v62 }
 0xabc   :  { %vm368_vm10 = vcmp.ge.s32.totalorder %v367_v63, %v779_v34 }
 0xabd   :  { %v369_v0 = vsel %vm368_vm10, %v352_v52, %v351_v51 }
 0xabe   :  { %v370_v1 = vor.u32 8192, %v369_v0 }
 0xac0   :  { %vm371_vm11 = vcmp.ge.s32.totalorder %v769_v10, %v370_v1 }
 0xac1   :  { %vm372_vm12 = vmand %vm771_vm4, %vm371_vm11 }
 0xac2   :  { %v373_v2 = vsel %vm372_vm12, 1, %v727_v5 }
 0xac3   :  { %v375_v3 = vshrl.u32 %v373_v2, 16  ;;  %v374_v4 = vand.u32 65535, %v373_v2 }
 0xac5   :  { %v377_v6 = vcvt.s32.f32 %v375_v3  ;;  %v376_v7 = vcvt.s32.f32 %v374_v4 }
 0xac7   :  { %380 = vadd.xlane.f32.xlu0 %v377_v6  ;;  %378 = vadd.xlane.f32.xlu1 %v376_v7 }
 0xb54   :  { %v381_v8 = vpop.xlane.xlu0 %380  ;;  %v379_v9 = vpop.xlane.xlu1 %378 }
 0xb55   :  { %v383_v11 = vcvt.f32.s32 %v381_v8  ;;  %v382_v14 = vcvt.f32.s32 %v379_v9 }
 0xb57   :  { %v384_v13 = vshll.u32 %v383_v11, 16 }
 0xb59   :  { %v385_v15 = vadd.s32 %v384_v13, %v382_v14 }
 0xb5b   :  { %vm386_vm13 = vcmp.ge.s32.totalorder %v385_v15, %v779_v34 }
 0xb5c   :  { %v387_v16 = vsel %vm386_vm13, %v370_v1, %v369_v0 }
 0xb5d   :  { %v388_v17 = vor.u32 4096, %v387_v16 }
 0xb5f   :  { %vm389_vm14 = vcmp.ge.s32.totalorder %v769_v10, %v388_v17 }
 0xb60   :  { %vm390_vm15 = vmand %vm771_vm4, %vm389_vm14 }
 0xb61   :  { %v391_v18 = vsel %vm390_vm15, 1, %v727_v5 }
 0xb62   :  { %v393_v19 = vshrl.u32 %v391_v18, 16  ;;  %v392_v20 = vand.u32 65535, %v391_v18 }
 0xb64   :  { %v395_v21 = vcvt.s32.f32 %v393_v19  ;;  %v394_v22 = vcvt.s32.f32 %v392_v20 }
 0xb66   :  { %398 = vadd.xlane.f32.xlu0 %v395_v21  ;;  %396 = vadd.xlane.f32.xlu1 %v394_v22 }
 0xbf3   :  { %v399_v23 = vpop.xlane.xlu0 %398  ;;  %v397_v24 = vpop.xlane.xlu1 %396 }
 0xbf4   :  { %v401_v25 = vcvt.f32.s32 %v399_v23  ;;  %v400_v27 = vcvt.f32.s32 %v397_v24 }
 0xbf6   :  { %v402_v26 = vshll.u32 %v401_v25, 16 }
 0xbf8   :  { %v403_v28 = vadd.s32 %v402_v26, %v400_v27 }
 0xbfa   :  { %vm404_vm0 = vcmp.ge.s32.totalorder %v403_v28, %v779_v34 }
 0xbfb   :  { %v405_v29 = vsel %vm404_vm0, %v388_v17, %v387_v16 }
 0xbfc   :  { %v406_v30 = vor.u32 2048, %v405_v29 }
 0xbfe   :  { %vm407_vm1 = vcmp.ge.s32.totalorder %v769_v10, %v406_v30 }
 0xbff   :  { %vm408_vm2 = vmand %vm771_vm4, %vm407_vm1 }
 0xc00   :  { %v409_v31 = vsel %vm408_vm2, 1, %v727_v5 }
 0xc01   :  { %v411_v32 = vshrl.u32 %v409_v31, 16  ;;  %v410_v33 = vand.u32 65535, %v409_v31 }
 0xc03   :  { %v413_v35 = vcvt.s32.f32 %v411_v32  ;;  %v412_v36 = vcvt.s32.f32 %v410_v33 }
 0xc05   :  { %416 = vadd.xlane.f32.xlu0 %v413_v35  ;;  %414 = vadd.xlane.f32.xlu1 %v412_v36 }
 0xc92   :  { %v417_v37 = vpop.xlane.xlu0 %416  ;;  %v415_v38 = vpop.xlane.xlu1 %414 }
 0xc93   :  { %v419_v39 = vcvt.f32.s32 %v417_v37  ;;  %v418_v41 = vcvt.f32.s32 %v415_v38 }
 0xc95   :  { %v420_v40 = vshll.u32 %v419_v39, 16 }
 0xc97   :  { %v421_v42 = vadd.s32 %v420_v40, %v418_v41 }
 0xc99   :  { %vm422_vm3 = vcmp.ge.s32.totalorder %v421_v42, %v779_v34 }
 0xc9a   :  { %v423_v43 = vsel %vm422_vm3, %v406_v30, %v405_v29 }
 0xc9b   :  { %v424_v44 = vor.u32 1024, %v423_v43 }
 0xc9d   :  { %vm425_vm5 = vcmp.ge.s32.totalorder %v769_v10, %v424_v44 }
 0xc9e   :  { %vm426_vm6 = vmand %vm771_vm4, %vm425_vm5 }
 0xc9f   :  { %v427_v45 = vsel %vm426_vm6, 1, %v727_v5 }
 0xca0   :  { %v429_v46 = vshrl.u32 %v427_v45, 16  ;;  %v428_v47 = vand.u32 65535, %v427_v45 }
 0xca2   :  { %v431_v48 = vcvt.s32.f32 %v429_v46  ;;  %v430_v49 = vcvt.s32.f32 %v428_v47 }
 0xca4   :  { %434 = vadd.xlane.f32.xlu0 %v431_v48  ;;  %432 = vadd.xlane.f32.xlu1 %v430_v49 }
 0xd31   :  { %v435_v50 = vpop.xlane.xlu0 %434  ;;  %v433_v51 = vpop.xlane.xlu1 %432 }
 0xd32   :  { %v437_v52 = vcvt.f32.s32 %v435_v50  ;;  %v436_v54 = vcvt.f32.s32 %v433_v51 }
 0xd34   :  { %v438_v53 = vshll.u32 %v437_v52, 16 }
 0xd36   :  { %v439_v55 = vadd.s32 %v438_v53, %v436_v54 }
 0xd38   :  { %vm440_vm7 = vcmp.ge.s32.totalorder %v439_v55, %v779_v34 }
 0xd39   :  { %v441_v56 = vsel %vm440_vm7, %v424_v44, %v423_v43 }
 0xd3a   :  { %v442_v57 = vor.u32 512, %v441_v56 }
 0xd3c   :  { %vm443_vm8 = vcmp.ge.s32.totalorder %v769_v10, %v442_v57 }
 0xd3d   :  { %vm444_vm9 = vmand %vm771_vm4, %vm443_vm8 }
 0xd3e   :  { %v445_v58 = vsel %vm444_vm9, 1, %v727_v5 }
 0xd3f   :  { %v447_v59 = vshrl.u32 %v445_v58, 16  ;;  %v446_v60 = vand.u32 65535, %v445_v58 }
 0xd41   :  { %v449_v61 = vcvt.s32.f32 %v447_v59  ;;  %v448_v62 = vcvt.s32.f32 %v446_v60 }
 0xd43   :  { %452 = vadd.xlane.f32.xlu0 %v449_v61  ;;  %450 = vadd.xlane.f32.xlu1 %v448_v62 }
 0xdd0   :  { %v453_v63 = vpop.xlane.xlu0 %452  ;;  %v451_v0 = vpop.xlane.xlu1 %450 }
 0xdd1   :  { %v455_v1 = vcvt.f32.s32 %v453_v63  ;;  %v454_v3 = vcvt.f32.s32 %v451_v0 }
 0xdd3   :  { %v456_v2 = vshll.u32 %v455_v1, 16 }
 0xdd5   :  { %v457_v4 = vadd.s32 %v456_v2, %v454_v3 }
 0xdd7   :  { %vm458_vm10 = vcmp.ge.s32.totalorder %v457_v4, %v779_v34 }
 0xdd8   :  { %v459_v6 = vsel %vm458_vm10, %v442_v57, %v441_v56 }
 0xdd9   :  { %v460_v7 = vor.u32 256, %v459_v6 }
 0xddb   :  { %vm461_vm11 = vcmp.ge.s32.totalorder %v769_v10, %v460_v7 }
 0xddc   :  { %vm462_vm12 = vmand %vm771_vm4, %vm461_vm11 }
 0xddd   :  { %v463_v8 = vsel %vm462_vm12, 1, %v727_v5 }
 0xdde   :  { %v465_v9 = vshrl.u32 %v463_v8, 16  ;;  %v464_v11 = vand.u32 65535, %v463_v8 }
 0xde0   :  { %v467_v13 = vcvt.s32.f32 %v465_v9  ;;  %v466_v14 = vcvt.s32.f32 %v464_v11 }
 0xde2   :  { %470 = vadd.xlane.f32.xlu0 %v467_v13  ;;  %468 = vadd.xlane.f32.xlu1 %v466_v14 }
 0xe6f   :  { %v471_v15 = vpop.xlane.xlu0 %470  ;;  %v469_v16 = vpop.xlane.xlu1 %468 }
 0xe70   :  { %v473_v17 = vcvt.f32.s32 %v471_v15  ;;  %v472_v19 = vcvt.f32.s32 %v469_v16 }
 0xe72   :  { %v474_v18 = vshll.u32 %v473_v17, 16 }
 0xe74   :  { %v475_v20 = vadd.s32 %v474_v18, %v472_v19 }
 0xe76   :  { %vm476_vm13 = vcmp.ge.s32.totalorder %v475_v20, %v779_v34 }
 0xe77   :  { %v477_v21 = vsel %vm476_vm13, %v460_v7, %v459_v6 }
 0xe78   :  { %v478_v22 = vor.u32 128, %v477_v21 }
 0xe7a   :  { %vm479_vm14 = vcmp.ge.s32.totalorder %v769_v10, %v478_v22 }
 0xe7b   :  { %vm480_vm15 = vmand %vm771_vm4, %vm479_vm14 }
 0xe7c   :  { %v481_v23 = vsel %vm480_vm15, 1, %v727_v5 }
 0xe7d   :  { %v483_v24 = vshrl.u32 %v481_v23, 16  ;;  %v482_v25 = vand.u32 65535, %v481_v23 }
 0xe7f   :  { %v485_v26 = vcvt.s32.f32 %v483_v24  ;;  %v484_v27 = vcvt.s32.f32 %v482_v25 }
 0xe81   :  { %488 = vadd.xlane.f32.xlu0 %v485_v26  ;;  %486 = vadd.xlane.f32.xlu1 %v484_v27 }
 0xf0e   :  { %v489_v28 = vpop.xlane.xlu0 %488  ;;  %v487_v29 = vpop.xlane.xlu1 %486 }
 0xf0f   :  { %v491_v30 = vcvt.f32.s32 %v489_v28  ;;  %v490_v32 = vcvt.f32.s32 %v487_v29 }
 0xf11   :  { %v492_v31 = vshll.u32 %v491_v30, 16 }
 0xf13   :  { %v493_v33 = vadd.s32 %v492_v31, %v490_v32 }
 0xf15   :  { %vm494_vm0 = vcmp.ge.s32.totalorder %v493_v33, %v779_v34 }
 0xf16   :  { %v495_v35 = vsel %vm494_vm0, %v478_v22, %v477_v21 }
 0xf17   :  { %v496_v36 = vor.u32 64, %v495_v35 }
 0xf19   :  { %vm497_vm1 = vcmp.ge.s32.totalorder %v769_v10, %v496_v36 }
 0xf1a   :  { %vm498_vm2 = vmand %vm771_vm4, %vm497_vm1 }
 0xf1b   :  { %v499_v37 = vsel %vm498_vm2, 1, %v727_v5 }
 0xf1c   :  { %v501_v38 = vshrl.u32 %v499_v37, 16  ;;  %v500_v39 = vand.u32 65535, %v499_v37 }
 0xf1e   :  { %v503_v40 = vcvt.s32.f32 %v501_v38  ;;  %v502_v41 = vcvt.s32.f32 %v500_v39 }
 0xf20   :  { %506 = vadd.xlane.f32.xlu0 %v503_v40  ;;  %504 = vadd.xlane.f32.xlu1 %v502_v41 }
 0xfad   :  { %v507_v42 = vpop.xlane.xlu0 %506  ;;  %v505_v43 = vpop.xlane.xlu1 %504 }
 0xfae   :  { %v509_v44 = vcvt.f32.s32 %v507_v42  ;;  %v508_v46 = vcvt.f32.s32 %v505_v43 }
 0xfb0   :  { %v510_v45 = vshll.u32 %v509_v44, 16 }
 0xfb2   :  { %v511_v47 = vadd.s32 %v510_v45, %v508_v46 }
 0xfb4   :  { %vm512_vm3 = vcmp.ge.s32.totalorder %v511_v47, %v779_v34 }
 0xfb5   :  { %v513_v48 = vsel %vm512_vm3, %v496_v36, %v495_v35 }
 0xfb6   :  { %v514_v49 = vor.u32 32, %v513_v48 }
 0xfb8   :  { %vm515_vm5 = vcmp.ge.s32.totalorder %v769_v10, %v514_v49 }
 0xfb9   :  { %vm516_vm6 = vmand %vm771_vm4, %vm515_vm5 }
 0xfba   :  { %v517_v50 = vsel %vm516_vm6, 1, %v727_v5 }
 0xfbb   :  { %v519_v51 = vshrl.u32 %v517_v50, 16  ;;  %v518_v52 = vand.u32 65535, %v517_v50 }
 0xfbd   :  { %v521_v53 = vcvt.s32.f32 %v519_v51  ;;  %v520_v54 = vcvt.s32.f32 %v518_v52 }
 0xfbf   :  { %524 = vadd.xlane.f32.xlu0 %v521_v53  ;;  %522 = vadd.xlane.f32.xlu1 %v520_v54 }
0x104c   :  { %v525_v55 = vpop.xlane.xlu0 %524  ;;  %v523_v56 = vpop.xlane.xlu1 %522 }
0x104d   :  { %v527_v57 = vcvt.f32.s32 %v525_v55  ;;  %v526_v59 = vcvt.f32.s32 %v523_v56 }
0x104f   :  { %v528_v58 = vshll.u32 %v527_v57, 16 }
0x1051   :  { %v529_v60 = vadd.s32 %v528_v58, %v526_v59 }
0x1053   :  { %vm530_vm7 = vcmp.ge.s32.totalorder %v529_v60, %v779_v34 }
0x1054   :  { %v531_v61 = vsel %vm530_vm7, %v514_v49, %v513_v48 }
0x1055   :  { %v532_v62 = vor.u32 16, %v531_v61 }
0x1057   :  { %vm533_vm8 = vcmp.ge.s32.totalorder %v769_v10, %v532_v62 }
0x1058   :  { %vm534_vm9 = vmand %vm771_vm4, %vm533_vm8 }
0x1059   :  { %v535_v63 = vsel %vm534_vm9, 1, %v727_v5 }
0x105a   :  { %v537_v0 = vshrl.u32 %v535_v63, 16  ;;  %v536_v1 = vand.u32 65535, %v535_v63 }
0x105c   :  { %v539_v2 = vcvt.s32.f32 %v537_v0  ;;  %v538_v3 = vcvt.s32.f32 %v536_v1 }
0x105e   :  { %542 = vadd.xlane.f32.xlu0 %v539_v2  ;;  %540 = vadd.xlane.f32.xlu1 %v538_v3 }
0x10eb   :  { %v543_v4 = vpop.xlane.xlu0 %542  ;;  %v541_v6 = vpop.xlane.xlu1 %540 }
0x10ec   :  { %v545_v7 = vcvt.f32.s32 %v543_v4  ;;  %v544_v9 = vcvt.f32.s32 %v541_v6 }
0x10ee   :  { %v546_v8 = vshll.u32 %v545_v7, 16 }
0x10f0   :  { %v547_v11 = vadd.s32 %v546_v8, %v544_v9 }
0x10f2   :  { %vm548_vm10 = vcmp.ge.s32.totalorder %v547_v11, %v779_v34 }
0x10f3   :  { %v549_v13 = vsel %vm548_vm10, %v532_v62, %v531_v61  ;;  %vm624_vm10 = vcmp.gt.s32.totalorder %v779_v34, 0 }
0x10f4   :  { %v550_v14 = vor.u32 8, %v549_v13 }
0x10f6   :  { %vm551_vm11 = vcmp.ge.s32.totalorder %v769_v10, %v550_v14 }
0x10f7   :  { %vm552_vm12 = vmand %vm771_vm4, %vm551_vm11 }
0x10f8   :  { %v553_v15 = vsel %vm552_vm12, 1, %v727_v5 }
0x10f9   :  { %v555_v16 = vshrl.u32 %v553_v15, 16  ;;  %v554_v17 = vand.u32 65535, %v553_v15 }
0x10fb   :  { %v557_v18 = vcvt.s32.f32 %v555_v16  ;;  %v556_v19 = vcvt.s32.f32 %v554_v17 }
0x10fd   :  { %560 = vadd.xlane.f32.xlu0 %v557_v18  ;;  %558 = vadd.xlane.f32.xlu1 %v556_v19 }
0x118a   :  { %v561_v20 = vpop.xlane.xlu0 %560  ;;  %v559_v21 = vpop.xlane.xlu1 %558 }
0x118b   :  { %v563_v22 = vcvt.f32.s32 %v561_v20  ;;  %v562_v24 = vcvt.f32.s32 %v559_v21 }
0x118d   :  { %v564_v23 = vshll.u32 %v563_v22, 16 }
0x118f   :  { %v565_v25 = vadd.s32 %v564_v23, %v562_v24 }
0x1191   :  { %vm566_vm13 = vcmp.ge.s32.totalorder %v565_v25, %v779_v34 }
0x1192   :  { %v567_v26 = vsel %vm566_vm13, %v550_v14, %v549_v13 }
0x1193   :  { %v568_v27 = vor.u32 4, %v567_v26 }
0x1195   :  { %vm569_vm14 = vcmp.ge.s32.totalorder %v769_v10, %v568_v27 }
0x1196   :  { %vm570_vm15 = vmand %vm771_vm4, %vm569_vm14 }
0x1197   :  { %v571_v28 = vsel %vm570_vm15, 1, %v727_v5 }
0x1198   :  { %v573_v29 = vshrl.u32 %v571_v28, 16  ;;  %v572_v30 = vand.u32 65535, %v571_v28 }
0x119a   :  { %v575_v31 = vcvt.s32.f32 %v573_v29  ;;  %v574_v32 = vcvt.s32.f32 %v572_v30 }
0x119c   :  { %578 = vadd.xlane.f32.xlu0 %v575_v31  ;;  %576 = vadd.xlane.f32.xlu1 %v574_v32 }
0x1229   :  { %v579_v33 = vpop.xlane.xlu0 %578  ;;  %v577_v35 = vpop.xlane.xlu1 %576 }
0x122a   :  { %v581_v36 = vcvt.f32.s32 %v579_v33  ;;  %v580_v38 = vcvt.f32.s32 %v577_v35 }
0x122c   :  { %v582_v37 = vshll.u32 %v581_v36, 16 }
0x122e   :  { %v583_v39 = vadd.s32 %v582_v37, %v580_v38 }
0x1230   :  { %vm584_vm0 = vcmp.ge.s32.totalorder %v583_v39, %v779_v34 }
0x1231   :  { %v585_v40 = vsel %vm584_vm0, %v568_v27, %v567_v26 }
0x1232   :  { %v586_v41 = vor.u32 2, %v585_v40 }
0x1234   :  { %vm587_vm1 = vcmp.ge.s32.totalorder %v769_v10, %v586_v41 }
0x1235   :  { %vm588_vm2 = vmand %vm771_vm4, %vm587_vm1 }
0x1236   :  { %v589_v42 = vsel %vm588_vm2, 1, %v727_v5 }
0x1237   :  { %v591_v43 = vshrl.u32 %v589_v42, 16  ;;  %v590_v44 = vand.u32 65535, %v589_v42 }
0x1239   :  { %v593_v45 = vcvt.s32.f32 %v591_v43  ;;  %v592_v46 = vcvt.s32.f32 %v590_v44 }
0x123b   :  { %596 = vadd.xlane.f32.xlu0 %v593_v45  ;;  %594 = vadd.xlane.f32.xlu1 %v592_v46 }
0x12c8   :  { %v597_v47 = vpop.xlane.xlu0 %596  ;;  %v595_v48 = vpop.xlane.xlu1 %594 }
0x12c9   :  { %v599_v49 = vcvt.f32.s32 %v597_v47  ;;  %v598_v51 = vcvt.f32.s32 %v595_v48 }
0x12cb   :  { %v600_v50 = vshll.u32 %v599_v49, 16 }
0x12cd   :  { %v601_v52 = vadd.s32 %v600_v50, %v598_v51 }
0x12cf   :  { %vm602_vm3 = vcmp.ge.s32.totalorder %v601_v52, %v779_v34 }
0x12d0   :  { %v603_v53 = vsel %vm602_vm3, %v586_v41, %v585_v40 }
0x12d1   :  { %v604_v54 = vor.u32 1, %v603_v53 }
0x12d3   :  { %vm605_vm5 = vcmp.ge.s32.totalorder %v769_v10, %v604_v54 }
0x12d4   :  { %vm606_vm6 = vmand %vm771_vm4, %vm605_vm5 }
0x12d5   :  { %v607_v55 = vsel %vm606_vm6, 1, %v727_v5  ;;  %v652_v5 = vld [vmem:[#allocation2] sm:$0xff] }
0x12d6   :  { %v609_v56 = vshrl.u32 %v607_v55, 16  ;;  %v608_v57 = vand.u32 65535, %v607_v55 }
0x12d8   :  { %v611_v58 = vcvt.s32.f32 %v609_v56  ;;  %v610_v59 = vcvt.s32.f32 %v608_v57 }
0x12da   :  { %614 = vadd.xlane.f32.xlu0 %v611_v58  ;;  %612 = vadd.xlane.f32.xlu1 %v610_v59 }
0x1367   :  { %v615_v60 = vpop.xlane.xlu0 %614  ;;  %v613_v61 = vpop.xlane.xlu1 %612 }
0x1368   :  { %v617_v62 = vcvt.f32.s32 %v615_v60  ;;  %v616_v0 = vcvt.f32.s32 %v613_v61 }
0x136a   :  { %v618_v63 = vshll.u32 %v617_v62, 16 }
0x136c   :  { %v619_v1 = vadd.s32 %v618_v63, %v616_v0 }
0x136e   :  { %vm620_vm7 = vcmp.ge.s32.totalorder %v619_v1, %v779_v34 }
0x136f   :  { %v621_v2 = vsel %vm620_vm7, %v604_v54, %v603_v53 }
0x1370   :  { %vm622_vm8 = vcmp.ge.s32.totalorder %v769_v10, %v621_v2 }
0x1371   :  { %vm623_vm9 = vmand %vm771_vm4, %vm622_vm8 }
0x1372   :  { %vm627_vm11 = vmand %vm623_vm9, %vm624_vm10 }
0x1373   :  { %v628_v3 = vsel %vm627_vm11, 103, %v652_v5 }
0x1374   :  { %629 = vst [vmem:[#allocation7] sm:$0xff] %v628_v3 }
0x1375   :  { %708 = shalt.err (!%p705_p6)
}
0x1376   :  { %s709_s8 = scalar_lea.hbm %s951_s2, 128 }
0x1377   :  { %p710_p7 = scmp.ne.s32.totalorder %s951_s2, %s709_s8  ;;  %p713_p8 = scmp.lt.u32.totalorder %s709_s8, %s951_s2 }
0x1379   :  { %p715_p9 = pnand %p713_p8, %p710_p7 }
0x137b   :  { %718 = shalt.err (!%p715_p9)
}
0x137c   :  { %639 = dma.vmem_to_hbm [thread:$0]  %s637_s4, 128, %s951_s2, [#allocation4]  }
0x137d   :  { %723 = dma.done.wait [#allocation4], 128  }
0x137e   :  { %724 = vsyncadd [#allocation4], 4294967168 }
0x137f   :  { %643 = vsyncpa [#allocation3], 1 }
0x1380   :  { %644 = vsyncpa [#allocation6], 1 }
0x1381   :  { %645 = vsyncpa [#allocation4], 1 }

</bundles_post_ra>
